<compile_context>
chip_gen: v6e
topology: v6e:2x2x1
jax: 0.10.0
libtpu: 0.0.40
codegen_flags: <defaults>
</compile_context>

<pallas_src>
import jax
import jax.numpy as jnp
from jax.experimental import pallas as pl
from jax.experimental.pallas import tpu as pltpu

HIDDEN = 768          # allegro/herbert-klej-cased-v1 hidden_size
H1, H2, H3 = 256, 256, 128
NUM_LABELS = 4        # ['normal', 'voting_turnout', 'encouragement', 'inducement']
OUT_PAD = 128         # lane-dense padded output width (multiple of 128)


def _mlp_head_kernel(x_ref,
                     w1_ref, b1_ref,
                     w2_ref, b2_ref,
                     w3_ref, b3_ref,
                     w4_ref, b4_ref,
                     o_ref):
    # x tile: (TM, HIDDEN) bf16.  Weights bf16 [in,out], biases f32 [1,out].
    x = x_ref[...]

    h = jnp.dot(x, w1_ref[...], preferred_element_type=jnp.float32) + b1_ref[...]
    h = jnp.maximum(h, 0.0)

    h = jnp.dot(h.astype(jnp.bfloat16), w2_ref[...],
                preferred_element_type=jnp.float32) + b2_ref[...]
    h = jnp.maximum(h, 0.0)
    # Dropout(0.3) -> identity at inference time.

    h = jnp.dot(h.astype(jnp.bfloat16), w3_ref[...],
                preferred_element_type=jnp.float32) + b3_ref[...]
    h = jnp.maximum(h, 0.0)
    # Dropout(0.3) -> identity at inference time.

    logits = jnp.dot(h.astype(jnp.bfloat16), w4_ref[...],
                     preferred_element_type=jnp.float32) + b4_ref[...]

    # Mask padded lanes (columns >= NUM_LABELS) before the softmax.
    lane = jax.lax.broadcasted_iota(jnp.int32, logits.shape, 1)
    logits = jnp.where(lane < NUM_LABELS, logits, -1e30)

    # Softmax(dim=1) over the 128-wide padded tile (padding contributes 0).
    m = jnp.max(logits, axis=1, keepdims=True)
    e = jnp.exp(logits - m)
    denom = jnp.sum(e, axis=1, keepdims=True)
    o_ref[...] = e * pl.reciprocal(denom, approx=False)


def agitation_head(x, params, *, tm=128):
    """x: [B, HIDDEN] f32 pooled embedding -> [B, NUM_LABELS] softmax probs."""
    (w1, b1), (w2, b2), (w3, b3), (w4, b4) = params
    B = x.shape[0]
    b_pad = pl.cdiv(B, tm) * tm
    if b_pad != B:
        x = jnp.pad(x, ((0, b_pad - B), (0, 0)))
    x = x.astype(jnp.bfloat16)
    grid = (b_pad // tm,)

    const = lambda i: (0, 0)          # weights/biases stay resident in VMEM
    in_specs = [
        pl.BlockSpec((tm, HIDDEN), lambda i: (i, 0)),
        pl.BlockSpec((HIDDEN, H1), const), pl.BlockSpec((1, H1), const),
        pl.BlockSpec((H1, H2), const),     pl.BlockSpec((1, H2), const),
        pl.BlockSpec((H2, H3), const),     pl.BlockSpec((1, H3), const),
        pl.BlockSpec((H3, OUT_PAD), const), pl.BlockSpec((1, OUT_PAD), const),
    ]
    out_spec = pl.BlockSpec((tm, OUT_PAD), lambda i: (i, 0))

    flops = 2 * b_pad * (HIDDEN * H1 + H1 * H2 + H2 * H3 + H3 * OUT_PAD)
    bytes_accessed = (
        b_pad * HIDDEN * 2                              # x (bf16)
        + (HIDDEN * H1 + H1 * H2 + H2 * H3 + H3 * OUT_PAD) * 2   # weights (bf16)
        + (H1 + H2 + H3 + OUT_PAD) * 4                  # biases (f32)
        + b_pad * OUT_PAD * 4                           # output (f32)
    )

    out = pl.pallas_call(
        _mlp_head_kernel,
        out_shape=jax.ShapeDtypeStruct((b_pad, OUT_PAD), jnp.float32),
        grid_spec=pltpu.PrefetchScalarGridSpec(
            num_scalar_prefetch=0,
            grid=grid,
            in_specs=in_specs,
            out_specs=out_spec,
        ),
        compiler_params=pltpu.CompilerParams(
            dimension_semantics=("parallel",)),
        cost_estimate=pl.CostEstimate(
            flops=flops,
            transcendentals=b_pad * OUT_PAD,
            bytes_accessed=bytes_accessed),
    )(x, w1, b1, w2, b2, w3, b3, w4, b4)

    return out[:B, :NUM_LABELS]


def init_params(key):
    """Deterministic PyTorch-style (uniform +-1/sqrt(fan_in)) Linear init, f32."""
    dims = [(HIDDEN, H1), (H1, H2), (H2, H3), (H3, NUM_LABELS)]
    params = []
    for (fan_in, fan_out) in dims:
        key, kw, kb = jax.random.split(key, 3)
        bound = 1.0 / jnp.sqrt(fan_in)
        # stored as [in, out] (transposed vs torch's [out, in]) for x @ W
        w = jax.random.uniform(kw, (fan_in, fan_out), jnp.float32, -bound, bound)
        b = jax.random.uniform(kb, (1, fan_out), jnp.float32, -bound, bound)
        params.append((w, b))
    return params


def prepare_params(params_f32):
    """bf16 weights (MXU-native), f32 biases; pad layer 4 to 128 lanes."""
    prepped = []
    for i, (w, b) in enumerate(params_f32):
        if i == 3:
            w = jnp.pad(w, ((0, 0), (0, OUT_PAD - NUM_LABELS)))
            b = jnp.pad(b, ((0, 0), (0, OUT_PAD - NUM_LABELS)))
        prepped.append((w.astype(jnp.bfloat16), b.astype(jnp.float32)))
    return prepped


def reference_head(x, params_f32):
    """Pure-JAX reference mirroring the kernel's precision (bf16 ops, f32 acc)."""
    h = x
    for i, (w, b) in enumerate(params_f32):
        h = jnp.dot(h.astype(jnp.bfloat16), w.astype(jnp.bfloat16),
                    preferred_element_type=jnp.float32) + b
        if i < 3:
            h = jnp.maximum(h, 0.0)
    return jax.nn.softmax(h, axis=1)


if __name__ == "__main__":
    key = jax.random.PRNGKey(0)
    kx, kp = jax.random.split(key)

    # TODO(synk): tokenizer + HerBERT encoder are not translatable to a Pallas
    # kernel; we stand in the pooler_output with a deterministic random tensor.
    batch = 2
    x = jax.random.normal(kx, (batch, HIDDEN), dtype=jnp.float32)
    params_f32 = init_params(kp)
    params = prepare_params(params_f32)

    out = agitation_head(x, params)
    out = jax.block_until_ready(out)

    ref = reference_head(x, params_f32)
    assert out.shape == (batch, NUM_LABELS)
    assert jnp.allclose(jnp.sum(out, axis=1), 1.0, atol=1e-5)
    assert jnp.allclose(out, ref, atol=1e-4, rtol=1e-4)

    print("KERNEL_OK")
</pallas_src>

<mosaic_0001>
module attributes {stable_mosaic.version = 11 : i64} {
  func.func @_mlp_head_kernel(%arg0: i32, %arg1: memref<128x768xbf16, #tpu.memory_space<vmem>>, %arg2: memref<768x256xbf16, #tpu.memory_space<vmem>>, %arg3: memref<1x256xf32, #tpu.memory_space<vmem>>, %arg4: memref<256x256xbf16, #tpu.memory_space<vmem>>, %arg5: memref<1x256xf32, #tpu.memory_space<vmem>>, %arg6: memref<256x128xbf16, #tpu.memory_space<vmem>>, %arg7: memref<1x128xf32, #tpu.memory_space<vmem>>, %arg8: memref<128x128xbf16, #tpu.memory_space<vmem>>, %arg9: memref<1x128xf32, #tpu.memory_space<vmem>>, %arg10: memref<128x128xf32, #tpu.memory_space<vmem>>) attributes {dimension_semantics = [#tpu.dimension_semantics<parallel>], iteration_bounds = array<i64: 1>, scalar_prefetch = 0 : i64, scratch_operands = 0 : i64, tpu.core_type = #tpu.core_type<tc>, window_params = [{transform_indices = @transform_0, window_bounds = array<i64: 128, 768>}, {pipeline_mode = #tpu.pipeline_mode<synchronous>, transform_indices = @transform_1, window_bounds = array<i64: 768, 256>}, {pipeline_mode = #tpu.pipeline_mode<synchronous>, transform_indices = @transform_2, window_bounds = array<i64: 1, 256>}, {pipeline_mode = #tpu.pipeline_mode<synchronous>, transform_indices = @transform_3, window_bounds = array<i64: 256, 256>}, {pipeline_mode = #tpu.pipeline_mode<synchronous>, transform_indices = @transform_4, window_bounds = array<i64: 1, 256>}, {pipeline_mode = #tpu.pipeline_mode<synchronous>, transform_indices = @transform_5, window_bounds = array<i64: 256, 128>}, {pipeline_mode = #tpu.pipeline_mode<synchronous>, transform_indices = @transform_6, window_bounds = array<i64: 1, 128>}, {pipeline_mode = #tpu.pipeline_mode<synchronous>, transform_indices = @transform_7, window_bounds = array<i64: 128, 128>}, {pipeline_mode = #tpu.pipeline_mode<synchronous>, transform_indices = @transform_8, window_bounds = array<i64: 1, 128>}, {transform_indices = @transform_9, window_bounds = array<i64: 128, 128>}]} {
    %c0 = arith.constant 0 : index
    %c0_0 = arith.constant 0 : index
    %0 = vector.load %arg1[%c0, %c0_0] : memref<128x768xbf16, #tpu.memory_space<vmem>>, vector<128x768xbf16>
    %c0_1 = arith.constant 0 : index
    %c0_2 = arith.constant 0 : index
    %1 = vector.load %arg2[%c0_1, %c0_2] : memref<768x256xbf16, #tpu.memory_space<vmem>>, vector<768x256xbf16>
    %cst = arith.constant dense<0.000000e+00> : vector<128x256xf32>
    %2 = tpu.matmul %0, %1, %cst {dimension_numbers = #tpu.dot_dimension_numbers<[1], [0], [0], [1], [0, 0, 1, 1], [], []>} : vector<128x768xbf16>, vector<768x256xbf16>, vector<128x256xf32> -> vector<128x256xf32>
    %c0_3 = arith.constant 0 : index
    %c0_4 = arith.constant 0 : index
    %3 = vector.load %arg3[%c0_3, %c0_4] : memref<1x256xf32, #tpu.memory_space<vmem>>, vector<1x256xf32>
    %4 = vector.broadcast %3 : vector<1x256xf32> to vector<128x256xf32>
    %5 = arith.addf %2, %4 : vector<128x256xf32>
    %cst_5 = arith.constant 0.000000e+00 : f32
    %6 = vector.broadcast %cst_5 : f32 to vector<128x256xf32>
    %7 = arith.maximumf %5, %6 : vector<128x256xf32>
    %8 = arith.truncf %7 : vector<128x256xf32> to vector<128x256xbf16>
    %c0_6 = arith.constant 0 : index
    %c0_7 = arith.constant 0 : index
    %9 = vector.load %arg4[%c0_6, %c0_7] : memref<256x256xbf16, #tpu.memory_space<vmem>>, vector<256x256xbf16>
    %cst_8 = arith.constant dense<0.000000e+00> : vector<128x256xf32>
    %10 = tpu.matmul %8, %9, %cst_8 {dimension_numbers = #tpu.dot_dimension_numbers<[1], [0], [0], [1], [0, 0, 1, 1], [], []>} : vector<128x256xbf16>, vector<256x256xbf16>, vector<128x256xf32> -> vector<128x256xf32>
    %c0_9 = arith.constant 0 : index
    %c0_10 = arith.constant 0 : index
    %11 = vector.load %arg5[%c0_9, %c0_10] : memref<1x256xf32, #tpu.memory_space<vmem>>, vector<1x256xf32>
    %12 = vector.broadcast %11 : vector<1x256xf32> to vector<128x256xf32>
    %13 = arith.addf %10, %12 : vector<128x256xf32>
    %cst_11 = arith.constant 0.000000e+00 : f32
    %14 = vector.broadcast %cst_11 : f32 to vector<128x256xf32>
    %15 = arith.maximumf %13, %14 : vector<128x256xf32>
    %16 = arith.truncf %15 : vector<128x256xf32> to vector<128x256xbf16>
    %c0_12 = arith.constant 0 : index
    %c0_13 = arith.constant 0 : index
    %17 = vector.load %arg6[%c0_12, %c0_13] : memref<256x128xbf16, #tpu.memory_space<vmem>>, vector<256x128xbf16>
    %cst_14 = arith.constant dense<0.000000e+00> : vector<128x128xf32>
    %18 = tpu.matmul %16, %17, %cst_14 {dimension_numbers = #tpu.dot_dimension_numbers<[1], [0], [0], [1], [0, 0, 1, 1], [], []>} : vector<128x256xbf16>, vector<256x128xbf16>, vector<128x128xf32> -> vector<128x128xf32>
    %c0_15 = arith.constant 0 : index
    %c0_16 = arith.constant 0 : index
    %19 = vector.load %arg7[%c0_15, %c0_16] : memref<1x128xf32, #tpu.memory_space<vmem>>, vector<1x128xf32>
    %20 = vector.broadcast %19 : vector<1x128xf32> to vector<128x128xf32>
    %21 = arith.addf %18, %20 : vector<128x128xf32>
    %cst_17 = arith.constant 0.000000e+00 : f32
    %22 = vector.broadcast %cst_17 : f32 to vector<128x128xf32>
    %23 = arith.maximumf %21, %22 : vector<128x128xf32>
    %24 = arith.truncf %23 : vector<128x128xf32> to vector<128x128xbf16>
    %c0_18 = arith.constant 0 : index
    %c0_19 = arith.constant 0 : index
    %25 = vector.load %arg8[%c0_18, %c0_19] : memref<128x128xbf16, #tpu.memory_space<vmem>>, vector<128x128xbf16>
    %cst_20 = arith.constant dense<0.000000e+00> : vector<128x128xf32>
    %26 = tpu.matmul %24, %25, %cst_20 {dimension_numbers = #tpu.dot_dimension_numbers<[1], [0], [0], [1], [0, 0, 1, 1], [], []>} : vector<128x128xbf16>, vector<128x128xbf16>, vector<128x128xf32> -> vector<128x128xf32>
    %c0_21 = arith.constant 0 : index
    %c0_22 = arith.constant 0 : index
    %27 = vector.load %arg9[%c0_21, %c0_22] : memref<1x128xf32, #tpu.memory_space<vmem>>, vector<1x128xf32>
    %28 = vector.broadcast %27 : vector<1x128xf32> to vector<128x128xf32>
    %29 = arith.addf %26, %28 : vector<128x128xf32>
    %30 = tpu.iota {dimensions = array<i32: 1>} : vector<128x128xi32>
    %c4_i32 = arith.constant 4 : i32
    %31 = vector.broadcast %c4_i32 : i32 to vector<128x128xi32>
    %32 = arith.cmpi slt, %30, %31 : vector<128x128xi32>
    %cst_23 = arith.constant -1.000000e+30 : f32
    %33 = vector.broadcast %cst_23 : f32 to vector<128x128xf32>
    %34 = arith.select %32, %29, %33 : vector<128x128xi1>, vector<128x128xf32>
    %cst_24 = arith.constant dense<0xFF800000> : vector<128xf32>
    %35 = vector.multi_reduction <maximumf>, %34, %cst_24 [1] : vector<128x128xf32> to vector<128xf32>
    %36 = vector.shape_cast %35 : vector<128xf32> to vector<128x1xf32>
    %37 = vector.broadcast %36 : vector<128x1xf32> to vector<128x128xf32>
    %38 = arith.subf %34, %37 : vector<128x128xf32>
    %39 = math.exp %38 : vector<128x128xf32>
    %cst_25 = arith.constant dense<0.000000e+00> : vector<128xf32>
    %40 = vector.multi_reduction <add>, %39, %cst_25 [1] : vector<128x128xf32> to vector<128xf32>
    %41 = vector.shape_cast %40 : vector<128xf32> to vector<128x1xf32>
    %42 = tpu.reciprocal %41 : vector<128x1xf32> -> vector<128x1xf32>
    %43 = vector.broadcast %42 : vector<128x1xf32> to vector<128x128xf32>
    %44 = arith.mulf %39, %43 : vector<128x128xf32>
    %c0_26 = arith.constant 0 : index
    %c0_27 = arith.constant 0 : index
    %45 = vector.load %arg10[%c0_26, %c0_27] : memref<128x128xf32, #tpu.memory_space<vmem>>, vector<128x128xf32>
    tpu.vector_store %arg10[%c0_26, %c0_27], %44 {strides = array<i32>} : memref<128x128xf32, #tpu.memory_space<vmem>>, vector<128x128xf32>,
    return
  }
  func.func @transform_0(%arg0: i32) -> (i32, i32) {
    %c0_i32 = arith.constant 0 : i32
    %c0_i32_0 = arith.constant 0 : i32
    return %arg0, %c0_i32 : i32, i32
  }
  func.func @transform_1(%arg0: i32) -> (i32, i32) {
    %c0_i32 = arith.constant 0 : i32
    %c0_i32_0 = arith.constant 0 : i32
    %c0_i32_1 = arith.constant 0 : i32
    return %c0_i32, %c0_i32_0 : i32, i32
  }
  func.func @transform_2(%arg0: i32) -> (i32, i32) {
    %c0_i32 = arith.constant 0 : i32
    %c0_i32_0 = arith.constant 0 : i32
    %c0_i32_1 = arith.constant 0 : i32
    return %c0_i32, %c0_i32_0 : i32, i32
  }
  func.func @transform_3(%arg0: i32) -> (i32, i32) {
    %c0_i32 = arith.constant 0 : i32
    %c0_i32_0 = arith.constant 0 : i32
    %c0_i32_1 = arith.constant 0 : i32
    return %c0_i32, %c0_i32_0 : i32, i32
  }
  func.func @transform_4(%arg0: i32) -> (i32, i32) {
    %c0_i32 = arith.constant 0 : i32
    %c0_i32_0 = arith.constant 0 : i32
    %c0_i32_1 = arith.constant 0 : i32
    return %c0_i32, %c0_i32_0 : i32, i32
  }
  func.func @transform_5(%arg0: i32) -> (i32, i32) {
    %c0_i32 = arith.constant 0 : i32
    %c0_i32_0 = arith.constant 0 : i32
    %c0_i32_1 = arith.constant 0 : i32
    return %c0_i32, %c0_i32_0 : i32, i32
  }
  func.func @transform_6(%arg0: i32) -> (i32, i32) {
    %c0_i32 = arith.constant 0 : i32
    %c0_i32_0 = arith.constant 0 : i32
    %c0_i32_1 = arith.constant 0 : i32
    return %c0_i32, %c0_i32_0 : i32, i32
  }
  func.func @transform_7(%arg0: i32) -> (i32, i32) {
    %c0_i32 = arith.constant 0 : i32
    %c0_i32_0 = arith.constant 0 : i32
    %c0_i32_1 = arith.constant 0 : i32
    return %c0_i32, %c0_i32_0 : i32, i32
  }
  func.func @transform_8(%arg0: i32) -> (i32, i32) {
    %c0_i32 = arith.constant 0 : i32
    %c0_i32_0 = arith.constant 0 : i32
    %c0_i32_1 = arith.constant 0 : i32
    return %c0_i32, %c0_i32_0 : i32, i32
  }
  func.func @transform_9(%arg0: i32) -> (i32, i32) {
    %c0_i32 = arith.constant 0 : i32
    %c0_i32_0 = arith.constant 0 : i32
    return %arg0, %c0_i32 : i32, i32
  }
}

</mosaic_0001>

<bundles_post_ra>
// kernel: tpu_custom_call.1
= control target key start
LH: loop header
LB: loop body
LE: loop exit
PB: predicated region body
PF: predicated region fallthrough
CT: control target
= control target key end

     0   :  { %14 = vsyncpa [#allocation3], 0  ;;  %s3696_s0 = inlined_call_operand.hbm [shape: bf16[128,768], index: 0, kind: input, shape index: {}]   ;;  %s3697_s1 = inlined_call_operand.hbm [shape: bf16[768,256], index: 1, kind: input, shape index: {}]   ;;  %s3698_s2 = inlined_call_operand.vmem [shape: f32[1,256], index: 2, kind: input, shape index: {}]   ;;  %s3699_s3 = inlined_call_operand.hbm [shape: bf16[256,256], index: 3, kind: input, shape index: {}]   ;;  %s3700_s4 = inlined_call_operand.vmem [shape: f32[1,256], index: 4, kind: input, shape index: {}]   ;;  %s3701_s5 = inlined_call_operand.hbm [shape: bf16[256,128], index: 5, kind: input, shape index: {}]   ;;  %s3702_s6 = inlined_call_operand.vmem [shape: f32[1,128], index: 6, kind: input, shape index: {}]   ;;  %s3703_s7 = inlined_call_operand.hbm [shape: bf16[128,128], index: 7, kind: input, shape index: {}]   ;;  %s3704_s8 = inlined_call_operand.vmem [shape: f32[1,128], index: 8, kind: input, shape index: {}]   ;;  %s3705_s9 = inlined_call_operand.hbm [shape: f32[128,128], index: 9, kind: output, shape index: {}]  }
   0x1   :  { %15 = vsyncpa [#allocation6], 0 }
   0x2   :  { %16 = vsyncpa [#allocation9], 0 }
   0x3   :  { %17 = vsyncpa [#allocation4], 0  ;;  %s3158_s30 = smov [#allocation5]  }
   0x4   :  { %s35_s10 = sshll.u32 %s3158_s30, 4  ;;  %s36_s10 = int_to_ptr.vmem [resolvable:$true] %s35_s10 }
   0x5   :  { %s3038_s11 = scalar_lea.vmem %s36_s10, 12288  ;;  %p3043_p1 = scmp.lt.s32.totalorder %s36_s10, %s36_s10 }
   0x6   :  { %p3039_p0 = scmp.ne.s32.totalorder %s36_s10, %s3038_s11  ;;  %p3044_p2 = scmp.lt.s32.totalorder %s3038_s11, %s3038_s11 }
   0x8   :  { %p3045_p3 = por %p3044_p2, %p3043_p1 }
   0xa   :  { %p3046_p4 = pnand %p3045_p3, %p3039_p0 }
   0xc   :  { %3049 = shalt.err (!%p3046_p4)
}
   0xd   :  { %s3159_s12 = smov 128   ;;  %s3160_s13 = smov 8  }
   0xe   :  { %41 = dma.hbm_to_vmem [thread:$0]  %s3697_s1, 12288, %s36_s10, [#allocation6], %s3159_s12, %s3159_s12, %s3160_s13  }
   0xf   :  { %s3161_s16 = smov [#allocation8]  }
  0x10   :  { %s63_s17 = sshll.u32 %s3161_s16, 4  ;;  %s64_s17 = int_to_ptr.vmem [resolvable:$true] %s63_s17 }
  0x11   :  { %s3058_s18 = scalar_lea.vmem %s64_s17, 2048  ;;  %p3063_p6 = scmp.lt.s32.totalorder %s64_s17, %s64_s17 }
  0x12   :  { %p3059_p5 = scmp.ne.s32.totalorder %s64_s17, %s3058_s18  ;;  %p3064_p7 = scmp.lt.s32.totalorder %s3058_s18, %s3058_s18 }
  0x14   :  { %p3065_p8 = por %p3064_p7, %p3063_p6 }
  0x16   :  { %p3066_p9 = pnand %p3065_p8, %p3059_p5 }
  0x18   :  { %3069 = shalt.err (!%p3066_p9)
}
  0x19   :  { %s3162_s19 = smov 64   ;;  %s3163_s20 = smov 4  }
  0x1a   :  { %69 = dma.hbm_to_vmem [thread:$0]  %s3701_s5, 2048, %s64_s17, [#allocation9], %s3162_s19, %s3162_s19, %s3163_s20  }
  0x1b   :  { %s3164_s1 = smov [#allocation2]  }
  0x1c   :  { %s23_s23 = sshll.u32 %s3164_s1, 4  ;;  %s24_s23 = int_to_ptr.vmem [resolvable:$true] %s23_s23 }
  0x1d   :  { %s3078_s24 = scalar_lea.vmem %s24_s23, 6144  ;;  %p3083_p11 = scmp.lt.s32.totalorder %s24_s23, %s24_s23 }
  0x1e   :  { %p3079_p10 = scmp.ne.s32.totalorder %s24_s23, %s3078_s24  ;;  %p3084_p12 = scmp.lt.s32.totalorder %s3078_s24, %s3078_s24 }
  0x20   :  { %p3085_p13 = por %p3084_p12, %p3083_p11 }
  0x22   :  { %p3086_p0 = pnand %p3085_p13, %p3079_p10 }
  0x24   :  { %3089 = shalt.err (!%p3086_p0)
}
  0x25   :  { %s3165_s25 = smov 384   ;;  %s3166_s26 = smov 24  }
  0x26   :  { %29 = dma.hbm_to_vmem [thread:$0]  %s3696_s0, 6144, %s24_s23, [#allocation3], %s3165_s25, %s3165_s25, %s3166_s26  }
  0x27   :  { %s3167_s29 = smov [#allocation7]   ;;  %s3168_s5 = smov [#allocation10]  }
  0x28   :  { %s49_s30 = sshll.u32 %s3167_s29, 4  ;;  %s77_s10 = sshll.u32 %s3168_s5, 4  ;;  %s50_s30 = int_to_ptr.vmem [resolvable:$true] %s49_s30  ;;  %s78_s10 = int_to_ptr.vmem [resolvable:$true] %s77_s10 }
  0x29   :  { %s3098_s11 = scalar_lea.vmem %s50_s30, 4096  ;;  %p3103_p2 = scmp.lt.s32.totalorder %s50_s30, %s50_s30 }
  0x2a   :  { %p3099_p1 = scmp.ne.s32.totalorder %s50_s30, %s3098_s11  ;;  %p3104_p3 = scmp.lt.s32.totalorder %s3098_s11, %s3098_s11 }
  0x2c   :  { %p3105_p4 = por %p3104_p3, %p3103_p2 }
  0x2e   :  { %p3106_p5 = pnand %p3105_p4, %p3099_p1 }
  0x30   :  { %3109 = shalt.err (!%p3106_p5)
}
  0x31   :  { %55 = dma.hbm_to_vmem [thread:$0]  %s3699_s3, 4096, %s50_s30, [#allocation6], %s3159_s12, %s3159_s12, %s3160_s13  }
  0x32   :  { %s3118_s0 = scalar_lea.vmem %s78_s10, 1024  ;;  %p3123_p7 = scmp.lt.s32.totalorder %s78_s10, %s78_s10 }
  0x33   :  { %p3119_p6 = scmp.ne.s32.totalorder %s78_s10, %s3118_s0  ;;  %p3124_p8 = scmp.lt.s32.totalorder %s3118_s0, %s3118_s0 }
  0x35   :  { %p3125_p9 = por %p3124_p8, %p3123_p7 }
  0x37   :  { %p3126_p10 = pnand %p3125_p9, %p3119_p6 }
  0x39   :  { %3129 = shalt.err (!%p3126_p10)
}
  0x3a   :  { %83 = dma.hbm_to_vmem [thread:$0]  %s3703_s7, 1024, %s78_s10, [#allocation9], %s3162_s19, %s3162_s19, %s3163_s20  }
  0x3b   :  { %3150 = dma.done.wait [#allocation3], 6144  }
  0x3c   :  { %3151 = vsyncadd [#allocation3], 4294961152 }
  0x3d   :  { %3152 = dma.done.wait [#allocation6], 16384  }
  0x3e   :  { %3153 = vsyncadd [#allocation6], 4294950912 }
  0x3f   :  { %3154 = dma.done.wait [#allocation9], 3072  }
  0x40   :  { %3155 = vsyncadd [#allocation9], 4294964224  ;;  %v2678_v0 = vld [vmem:[#allocation5 + $0x74] ss:$8 sps:$4 sm:$0xff]   ;;  %v2680_v1 = vld [vmem:[#allocation5 + $0x70] ss:$8 sps:$4 sm:$0xff]  }
  0x41   :  { %978 = vmatprep.subr.bf16.mxu0 %v2678_v0  ;;  %v2681_v2 = vld [vmem:[#allocation5 + $0x174] ss:$8 sps:$4 sm:$0xff]   ;;  %v2683_v3 = vld [vmem:[#allocation5 + $0x170] ss:$8 sps:$4 sm:$0xff]   ;;  %v2684_v4 = vld [vmem:[#allocation5 + $0x64] ss:$8 sps:$4 sm:$0xff]  }
  0x42   :  { %979 = vmatpush1.bf16.msra.mxu0 %v2680_v1  ;;  %v2686_v5 = vld [vmem:[#allocation5 + $0x60] ss:$8 sps:$4 sm:$0xff]   ;;  %1091 = vmatprep.subr.bf16.mxu1 %v2681_v2  ;;  %v2687_v6 = vld [vmem:[#allocation5 + $0x164] ss:$8 sps:$4 sm:$0xff]   ;;  %v2690_v8 = vld [vmem:[#allocation5 + $0x54] ss:$8 sps:$4 sm:$0xff]  }
  0x43   :  { %1092 = vmatpush1.bf16.msra.mxu1 %v2683_v3  ;;  %980 = vmatprep.subr.bf16.mxu0 %v2684_v4  ;;  %v2689_v7 = vld [vmem:[#allocation5 + $0x160] ss:$8 sps:$4 sm:$0xff]   ;;  %v2692_v9 = vld [vmem:[#allocation5 + $0x50] ss:$8 sps:$4 sm:$0xff]   ;;  %v2693_v10 = vld [vmem:[#allocation5 + $0x154] ss:$8 sps:$4 sm:$0xff]  }
  0x44   :  { %1093 = vmatprep.subr.bf16.mxu1 %v2687_v6  ;;  %v2696_v11 = vld [vmem:[#allocation5 + $0x44] ss:$8 sps:$4 sm:$0xff]   ;;  %v2695_v12 = vld [vmem:[#allocation5 + $0x150] ss:$8 sps:$4 sm:$0xff]   ;;  %v2698_v14 = vld [vmem:[#allocation5 + $0x40] ss:$8 sps:$4 sm:$0xff]  }
  0x45   :  { %v2699_v13 = vld [vmem:[#allocation5 + $0x144] ss:$8 sps:$4 sm:$0xff]   ;;  %v2702_v15 = vld [vmem:[#allocation5 + $0x34] ss:$8 sps:$4 sm:$0xff]   ;;  %v2701_v16 = vld [vmem:[#allocation5 + $0x140] ss:$8 sps:$4 sm:$0xff]  }
  0x46   :  { %981 = vmatpush1.bf16.msra.mxu0 %v2686_v5  ;;  %v2705_v17 = vld [vmem:[#allocation5 + $0x134] ss:$8 sps:$4 sm:$0xff]   ;;  %v2704_v18 = vld [vmem:[#allocation5 + $0x30] ss:$8 sps:$4 sm:$0xff]   ;;  %v2708_v19 = vld [vmem:[#allocation5 + $0x24] ss:$8 sps:$4 sm:$0xff]  }
  0x47   :  { %982 = vmatprep.subr.bf16.mxu0 %v2690_v8  ;;  %1094 = vmatpush1.bf16.msra.mxu1 %v2689_v7  ;;  %v2707_v20 = vld [vmem:[#allocation5 + $0x130] ss:$8 sps:$4 sm:$0xff]   ;;  %v2711_v21 = vld [vmem:[#allocation5 + $0x124] ss:$8 sps:$4 sm:$0xff]   ;;  %v2710_v22 = vld [vmem:[#allocation5 + $0x20] ss:$8 sps:$4 sm:$0xff]  }
  0x48   :  { %1095 = vmatprep.subr.bf16.mxu1 %v2693_v10  ;;  %v2714_v23 = vld [vmem:[#allocation5 + $0x14] ss:$8 sps:$4 sm:$0xff]   ;;  %v2713_v24 = vld [vmem:[#allocation5 + $0x120] ss:$8 sps:$4 sm:$0xff]   ;;  %v2716_v26 = vld [vmem:[#allocation5 + $0x10] ss:$8 sps:$4 sm:$0xff]  }
  0x49   :  { %v2717_v25 = vld [vmem:[#allocation5 + $0x114] ss:$8 sps:$4 sm:$0xff]   ;;  %v2720_v27 = vld [vmem:[#allocation5 + $0x4] ss:$8 sps:$4 sm:$0xff]   ;;  %v2719_v28 = vld [vmem:[#allocation5 + $0x110] ss:$8 sps:$4 sm:$0xff]  }
  0x4a   :  { %983 = vmatpush1.bf16.msra.mxu0 %v2692_v9  ;;  %v2723_v29 = vld [vmem:[#allocation5 + $0x104] ss:$8 sps:$4 sm:$0xff]   ;;  %v2722_v30 = vld [vmem:[#allocation5] ss:$8 sps:$4 sm:$0xff]   ;;  %v2726_v31 = vld [vmem:[#allocation5 + $0xf4] ss:$8 sps:$4 sm:$0xff]  }
  0x4b   :  { %984 = vmatprep.subr.bf16.mxu0 %v2696_v11  ;;  %1096 = vmatpush1.bf16.msra.mxu1 %v2695_v12  ;;  %v2725_v32 = vld [vmem:[#allocation5 + $0x100] ss:$8 sps:$4 sm:$0xff]   ;;  %v2729_v33 = vld [vmem:[#allocation5 + $0x1f4] ss:$8 sps:$4 sm:$0xff]   ;;  %v2728_v34 = vld [vmem:[#allocation5 + $0xf0] ss:$8 sps:$4 sm:$0xff]  }
  0x4c   :  { %1097 = vmatprep.subr.bf16.mxu1 %v2699_v13  ;;  %v2732_v35 = vld [vmem:[#allocation5 + $0xe4] ss:$8 sps:$4 sm:$0xff]   ;;  %v2731_v36 = vld [vmem:[#allocation5 + $0x1f0] ss:$8 sps:$4 sm:$0xff]   ;;  %v2734_v38 = vld [vmem:[#allocation5 + $0xe0] ss:$8 sps:$4 sm:$0xff]  }
  0x4d   :  { %v2735_v37 = vld [vmem:[#allocation5 + $0x1e4] ss:$8 sps:$4 sm:$0xff]   ;;  %v2738_v39 = vld [vmem:[#allocation5 + $0xd4] ss:$8 sps:$4 sm:$0xff]   ;;  %v2737_v40 = vld [vmem:[#allocation5 + $0x1e0] ss:$8 sps:$4 sm:$0xff]  }
  0x4e   :  { %985 = vmatpush1.bf16.msra.mxu0 %v2698_v14  ;;  %v2741_v41 = vld [vmem:[#allocation5 + $0x1d4] ss:$8 sps:$4 sm:$0xff]   ;;  %v2740_v42 = vld [vmem:[#allocation5 + $0xd0] ss:$8 sps:$4 sm:$0xff]   ;;  %v2744_v43 = vld [vmem:[#allocation5 + $0xc4] ss:$8 sps:$4 sm:$0xff]  }
  0x4f   :  { %986 = vmatprep.subr.bf16.mxu0 %v2702_v15  ;;  %1098 = vmatpush1.bf16.msra.mxu1 %v2701_v16  ;;  %v2743_v44 = vld [vmem:[#allocation5 + $0x1d0] ss:$8 sps:$4 sm:$0xff]   ;;  %v2747_v45 = vld [vmem:[#allocation5 + $0x1c4] ss:$8 sps:$4 sm:$0xff]   ;;  %v2746_v46 = vld [vmem:[#allocation5 + $0xc0] ss:$8 sps:$4 sm:$0xff]  }
  0x50   :  { %1099 = vmatprep.subr.bf16.mxu1 %v2705_v17  ;;  %v2775_v47 = vld [vmem:[#allocation2 + $0x4] ss:$24 sps:$4 sm:$0xff]   ;;  %v2749_v49 = vld [vmem:[#allocation5 + $0x1c0] ss:$8 sps:$4 sm:$0xff]   ;;  %v2752_v52 = vld [vmem:[#allocation5 + $0xb0] ss:$8 sps:$4 sm:$0xff]  }
  0x51   :  { %v2750_v48 = vld [vmem:[#allocation5 + $0xb4] ss:$8 sps:$4 sm:$0xff]   ;;  %1010 = vmatprep.mubr.bf16.mxu0 %v2775_v47  ;;  %v2782_v51 = vld [vmem:[#allocation2 + $0xc] ss:$24 sps:$4 sm:$0xff]   ;;  %v2755_v54 = vld [vmem:[#allocation5 + $0x1b0] ss:$8 sps:$4 sm:$0xff]  }
  0x52   :  { %987 = vmatpush1.bf16.msra.mxu0 %v2704_v18  ;;  %v2753_v50 = vld [vmem:[#allocation5 + $0x1b4] ss:$8 sps:$4 sm:$0xff]   ;;  %v2756_v53 = vld [vmem:[#allocation5 + $0xa4] ss:$8 sps:$4 sm:$0xff]   ;;  %1123 = vmatprep.mubr.bf16.mxu1 %v2782_v51  ;;  %v2758_v56 = vld [vmem:[#allocation5 + $0xa0] ss:$8 sps:$4 sm:$0xff]  }
  0x53   :  { %988 = vmatprep.subr.bf16.mxu0 %v2708_v19  ;;  %1100 = vmatpush1.bf16.msra.mxu1 %v2707_v20  ;;  %v2759_v55 = vld [vmem:[#allocation5 + $0x1a4] ss:$8 sps:$4 sm:$0xff]   ;;  %v2762_v57 = vld [vmem:[#allocation5 + $0x94] ss:$8 sps:$4 sm:$0xff]   ;;  %v2761_v58 = vld [vmem:[#allocation5 + $0x1a0] ss:$8 sps:$4 sm:$0xff]  }
  0x54   :  { %1101 = vmatprep.subr.bf16.mxu1 %v2711_v21  ;;  %v2765_v59 = vld [vmem:[#allocation5 + $0x194] ss:$8 sps:$4 sm:$0xff]   ;;  %v2764_v60 = vld [vmem:[#allocation5 + $0x90] ss:$8 sps:$4 sm:$0xff]   ;;  %v2768_v61 = vld [vmem:[#allocation5 + $0x84] ss:$8 sps:$4 sm:$0xff]  }
  0x55   :  { %v2767_v62 = vld [vmem:[#allocation5 + $0x190] ss:$8 sps:$4 sm:$0xff]   ;;  %v2771_v63 = vld [vmem:[#allocation5 + $0x184] ss:$8 sps:$4 sm:$0xff]   ;;  %v2770_v0 = vld [vmem:[#allocation5 + $0x80] ss:$8 sps:$4 sm:$0xff]  }
  0x56   :  { %989 = vmatpush1.bf16.msra.mxu0 %v2710_v22  ;;  %v2779_v1 = vld [vmem:[#allocation5 + $0x274] ss:$8 sps:$4 sm:$0xff]   ;;  %v2776_v2 = vld [vmem:[#allocation5 + $0x180] ss:$8 sps:$4 sm:$0xff]   ;;  %v2777_v4 = vld [vmem:[#allocation5 + $0x270] ss:$8 sps:$4 sm:$0xff]  }
  0x57   :  { %990 = vmatprep.subr.bf16.mxu0 %v2714_v23  ;;  %1102 = vmatpush1.bf16.msra.mxu1 %v2713_v24  ;;  %v2773_v3 = vld [vmem:[#allocation2] ss:$24 sps:$4 sm:$0xff]   ;;  %v2786_v6 = vld [vmem:[#allocation2 + $0x34] ss:$24 sps:$4 sm:$0xff]   ;;  %v2788_v11 = vld [vmem:[#allocation2 + $0x30] ss:$24 sps:$4 sm:$0xff]  }
  0x58   :  { %1103 = vmatprep.subr.bf16.mxu1 %v2717_v25  ;;  %v2780_v5 = vld [vmem:[#allocation2 + $0x8] ss:$24 sps:$4 sm:$0xff]   ;;  %v2785_v7 = vld [vmem:[#allocation5 + $0x264] ss:$8 sps:$4 sm:$0xff]   ;;  %v2792_v8 = vld [vmem:[#allocation2 + $0x3c] ss:$24 sps:$4 sm:$0xff]  }
  0x59   :  { %v2783_v9 = vld [vmem:[#allocation5 + $0x260] ss:$8 sps:$4 sm:$0xff]   ;;  %v2791_v10 = vld [vmem:[#allocation5 + $0x254] ss:$8 sps:$4 sm:$0xff]   ;;  %v2789_v12 = vld [vmem:[#allocation5 + $0x250] ss:$8 sps:$4 sm:$0xff]  }
  0x5a   :  { %991 = vmatpush1.bf16.msra.mxu0 %v2716_v26  ;;  %v2794_v13 = vld [vmem:[#allocation2 + $0x38] ss:$24 sps:$4 sm:$0xff]   ;;  %v2798_v14 = vld [vmem:[#allocation2 + $0x64] ss:$24 sps:$4 sm:$0xff]   ;;  %v2795_v17 = vld [vmem:[#allocation5 + $0x240] ss:$8 sps:$4 sm:$0xff]  }
  0x5b   :  { %992 = vmatprep.subr.bf16.mxu0 %v2720_v27  ;;  %1104 = vmatpush1.bf16.msra.mxu1 %v2719_v28  ;;  %v2797_v15 = vld [vmem:[#allocation5 + $0x244] ss:$8 sps:$4 sm:$0xff]   ;;  %v2803_v18 = vld [vmem:[#allocation5 + $0x234] ss:$8 sps:$4 sm:$0xff]   ;;  %v2800_v19 = vld [vmem:[#allocation2 + $0x60] ss:$24 sps:$4 sm:$0xff]  }
  0x5c   :  { %1105 = vmatprep.subr.bf16.mxu1 %v2723_v29  ;;  %v2804_v16 = vld [vmem:[#allocation2 + $0x6c] ss:$24 sps:$4 sm:$0xff]   ;;  %v2801_v20 = vld [vmem:[#allocation5 + $0x230] ss:$8 sps:$4 sm:$0xff]   ;;  %v2806_v21 = vld [vmem:[#allocation2 + $0x68] ss:$24 sps:$4 sm:$0xff]  }
  0x5d   :  { %v2810_v22 = vld [vmem:[#allocation2 + $0x94] ss:$24 sps:$4 sm:$0xff]   ;;  %v2807_v25 = vld [vmem:[#allocation5 + $0x220] ss:$8 sps:$4 sm:$0xff]   ;;  %v2813_v28 = vld [vmem:[#allocation5 + $0x210] ss:$8 sps:$4 sm:$0xff]  }
  0x5e   :  { %993 = vmatpush1.bf16.msra.mxu0 %v2722_v30  ;;  %v2809_v23 = vld [vmem:[#allocation5 + $0x224] ss:$8 sps:$4 sm:$0xff]   ;;  %v2816_v24 = vld [vmem:[#allocation2 + $0x9c] ss:$24 sps:$4 sm:$0xff]   ;;  %v2812_v27 = vld [vmem:[#allocation2 + $0x90] ss:$24 sps:$4 sm:$0xff]  }
  0x5f   :  { %994 = vmatprep.subr.bf16.mxu0 %v2726_v31  ;;  %1106 = vmatpush1.bf16.msra.mxu1 %v2725_v32  ;;  %v2815_v26 = vld [vmem:[#allocation5 + $0x214] ss:$8 sps:$4 sm:$0xff]   ;;  %v2818_v29 = vld [vmem:[#allocation2 + $0x98] ss:$24 sps:$4 sm:$0xff]   ;;  %v2821_v31 = vld [vmem:[#allocation5 + $0x204] ss:$8 sps:$4 sm:$0xff]  }
  0x60   :  { %1107 = vmatprep.subr.bf16.mxu1 %v2729_v33  ;;  %v2822_v30 = vld [vmem:[#allocation2 + $0xc4] ss:$24 sps:$4 sm:$0xff]   ;;  %v2819_v33 = vld [vmem:[#allocation5 + $0x200] ss:$8 sps:$4 sm:$0xff]  }
  0x61   :  { %v2828_v32 = vld [vmem:[#allocation2 + $0xcc] ss:$24 sps:$4 sm:$0xff]   ;;  %v2848_v51 = vld [vmem:[#allocation2 + $0x120] ss:$24 sps:$4 sm:$0xff]  }
  0x62   :  { %995 = vmatpush2.bf16.msra.mxu0 %v2728_v34  ;;  %v2827_v34 = vld [vmem:[#allocation5 + $0x2f4] ss:$8 sps:$4 sm:$0xff]   ;;  %v2845_v47 = vld [vmem:[#allocation5 + $0x2c4] ss:$8 sps:$4 sm:$0xff]  }
  0x63   :  { %996 = vmatprep.subr.bf16.mxu0 %v2732_v35  ;;  %1108 = vmatpush2.bf16.msra.mxu1 %v2731_v36  ;;  %v2824_v35 = vld [vmem:[#allocation2 + $0xc0] ss:$24 sps:$4 sm:$0xff]  }
  0x64   :  { %1109 = vmatprep.subr.bf16.mxu1 %v2735_v37  ;;  %v2825_v36 = vld [vmem:[#allocation5 + $0x2f0] ss:$8 sps:$4 sm:$0xff]   ;;  %v2830_v37 = vld [vmem:[#allocation2 + $0xc8] ss:$24 sps:$4 sm:$0xff]  }
  0x66   :  { %997 = vmatpush2.bf16.msra.mxu0 %v2734_v38  ;;  %v2833_v38 = vld [vmem:[#allocation5 + $0x2e4] ss:$8 sps:$4 sm:$0xff]  }
  0x67   :  { %998 = vmatprep.subr.bf16.mxu0 %v2738_v39  ;;  %1110 = vmatpush2.bf16.msra.mxu1 %v2737_v40  ;;  %v2834_v39 = vld [vmem:[#allocation2 + $0xf4] ss:$24 sps:$4 sm:$0xff]  }
  0x68   :  { %1111 = vmatprep.subr.bf16.mxu1 %v2741_v41  ;;  %v2840_v40 = vld [vmem:[#allocation2 + $0xfc] ss:$24 sps:$4 sm:$0xff]   ;;  %v2831_v41 = vld [vmem:[#allocation5 + $0x2e0] ss:$8 sps:$4 sm:$0xff]  }
  0x6a   :  { %999 = vmatpush2.bf16.msra.mxu0 %v2740_v42  ;;  %v2839_v42 = vld [vmem:[#allocation5 + $0x2d4] ss:$8 sps:$4 sm:$0xff]  }
  0x6b   :  { %1000 = vmatprep.subr.bf16.mxu0 %v2744_v43  ;;  %1112 = vmatpush2.bf16.msra.mxu1 %v2743_v44  ;;  %v2836_v43 = vld [vmem:[#allocation2 + $0xf0] ss:$24 sps:$4 sm:$0xff]  }
  0x6c   :  { %1113 = vmatprep.subr.bf16.mxu1 %v2747_v45  ;;  %v2837_v44 = vld [vmem:[#allocation5 + $0x2d0] ss:$8 sps:$4 sm:$0xff]   ;;  %v2846_v45 = vld [vmem:[#allocation2 + $0x124] ss:$24 sps:$4 sm:$0xff]  }
  0x6e   :  { %1001 = vmatpush2.bf16.msra.mxu0 %v2746_v46  ;;  %v2842_v46 = vld [vmem:[#allocation2 + $0xf8] ss:$24 sps:$4 sm:$0xff]  }
  0x6f   :  { %1002 = vmatprep.subr.bf16.mxu0 %v2750_v48  ;;  %1114 = vmatpush2.bf16.msra.mxu1 %v2749_v49  ;;  %v2852_v48 = vld [vmem:[#allocation2 + $0x12c] ss:$24 sps:$4 sm:$0xff]   ;;  %v2843_v49 = vld [vmem:[#allocation5 + $0x2c0] ss:$8 sps:$4 sm:$0xff]  }
  0x70   :  { %1115 = vmatprep.subr.bf16.mxu1 %v2753_v50  ;;  %v2851_v50 = vld [vmem:[#allocation5 + $0x2b4] ss:$8 sps:$4 sm:$0xff]  }
  0x72   :  { %1003 = vmatpush2.bf16.msra.mxu0 %v2752_v52  ;;  %v2849_v52 = vld [vmem:[#allocation5 + $0x2b0] ss:$8 sps:$4 sm:$0xff]  }
  0x73   :  { %1004 = vmatprep.subr.bf16.mxu0 %v2756_v53  ;;  %1116 = vmatpush2.bf16.msra.mxu1 %v2755_v54  ;;  %v2858_v53 = vld [vmem:[#allocation2 + $0x154] ss:$24 sps:$4 sm:$0xff]   ;;  %v2854_v54 = vld [vmem:[#allocation2 + $0x128] ss:$24 sps:$4 sm:$0xff]  }
  0x74   :  { %1117 = vmatprep.subr.bf16.mxu1 %v2759_v55  ;;  %v2857_v55 = vld [vmem:[#allocation5 + $0x2a4] ss:$8 sps:$4 sm:$0xff]  }
  0x76   :  { %1005 = vmatpush2.bf16.msra.mxu0 %v2758_v56  ;;  %v2864_v56 = vld [vmem:[#allocation2 + $0x15c] ss:$24 sps:$4 sm:$0xff]  }
  0x77   :  { %1006 = vmatprep.subr.bf16.mxu0 %v2762_v57  ;;  %1118 = vmatpush2.bf16.msra.mxu1 %v2761_v58  ;;  %v2855_v57 = vld [vmem:[#allocation5 + $0x2a0] ss:$8 sps:$4 sm:$0xff]   ;;  %v2863_v58 = vld [vmem:[#allocation5 + $0x294] ss:$8 sps:$4 sm:$0xff]  }
  0x78   :  { %1119 = vmatprep.subr.bf16.mxu1 %v2765_v59  ;;  %v2860_v59 = vld [vmem:[#allocation2 + $0x150] ss:$24 sps:$4 sm:$0xff]  }
  0x7a   :  { %1007 = vmatpush2.bf16.msra.mxu0 %v2764_v60  ;;  %v2861_v60 = vld [vmem:[#allocation5 + $0x290] ss:$8 sps:$4 sm:$0xff]  }
  0x7b   :  { %1008 = vmatprep.subr.bf16.mxu0 %v2768_v61  ;;  %1120 = vmatpush2.bf16.msra.mxu1 %v2767_v62  ;;  %v2872_v61 = vld [vmem:[#allocation2 + $0x14] ss:$24 sps:$4 sm:$0xff]   ;;  %v2866_v62 = vld [vmem:[#allocation2 + $0x158] ss:$24 sps:$4 sm:$0xff]  }
  0x7c   :  { %1121 = vmatprep.subr.bf16.mxu1 %v2771_v63  ;;  %v2869_v63 = vld [vmem:[#allocation5 + $0x284] ss:$8 sps:$4 sm:$0xff]  }
  0x7e   :  { %1009 = vmatpush2.bf16.msra.mxu0 %v2770_v0  ;;  %v2867_v0 = vld [vmem:[#allocation5 + $0x280] ss:$8 sps:$4 sm:$0xff]  }
  0x7f   :  { %1204 = vmatprep.subr.bf16.mxu0 %v2779_v1  ;;  %1122 = vmatpush2.bf16.msra.mxu1 %v2776_v2  ;;  %v2870_v1 = vld [vmem:[#allocation2 + $0x10] ss:$24 sps:$4 sm:$0xff]   ;;  %v2873_v2 = vld [vmem:[#allocation2 + $0x44] ss:$24 sps:$4 sm:$0xff]  }
  0x81   :  { %1011 = vmatmul.mubr.bf16.vlgmr.msra.gmra.mxu0 %v2773_v3  ;;  %v2875_v3 = vld [vmem:[#allocation2 + $0x40] ss:$24 sps:$4 sm:$0xff]  }
  0x82   :  { %1205 = vmatpush1.bf16.msra.mxu0 %v2777_v4  ;;  %1020 = vmatprep.mubr.bf16.mxu0 %v2786_v6  ;;  %v2876_v4 = vld [vmem:[#allocation2 + $0x74] ss:$24 sps:$4 sm:$0xff]  }
  0x83   :  { %1124 = vmatmul.mubr.bf16.vlgmr.msra.gmra.mxu1 %v2780_v5  ;;  %1206 = vmatprep.subr.bf16.mxu0 %v2785_v7  ;;  %v2878_v5 = vld [vmem:[#allocation2 + $0x70] ss:$24 sps:$4 sm:$0xff]   ;;  %v2896_v6 = vld [vmem:[#allocation7 + $0x74] ss:$8 sps:$4 sm:$0xff]  }
  0x84   :  { %1133 = vmatprep.mubr.bf16.mxu1 %v2792_v8  ;;  %v2879_v7 = vld [vmem:[#allocation2 + $0xa4] ss:$24 sps:$4 sm:$0xff]   ;;  %v2894_v8 = vld [vmem:[#allocation7 + $0x70] ss:$8 sps:$4 sm:$0xff]   ;;  %1569 = vmatprep.subr.bf16.mxu1 %v2896_v6 }
  0x85   :  { %1570 = vmatpush1.bf16.msra.mxu1 %v2894_v8  ;;  %v2950_v8 = vld [vmem:[#allocation8 + $0x58] sm:$0xff]  }
  0x86   :  { %1207 = vmatpush1.bf16.msra.mxu0 %v2783_v9  ;;  %v2899_v9 = vld [vmem:[#allocation7 + $0x64] ss:$8 sps:$4 sm:$0xff]  }
  0x87   :  { %1208 = vmatprep.subr.bf16.mxu0 %v2791_v10  ;;  %v2897_v10 = vld [vmem:[#allocation7 + $0x60] ss:$8 sps:$4 sm:$0xff]   ;;  %1571 = vmatprep.subr.bf16.mxu1 %v2899_v9 }
  0x89   :  { %1021 = vmatmul.mubr.bf16.gmra.mxu0 %v2788_v11  ;;  %1572 = vmatpush1.bf16.msra.mxu1 %v2897_v10  ;;  %v2881_v11 = vld [vmem:[#allocation2 + $0xa0] ss:$24 sps:$4 sm:$0xff]  }
  0x8a   :  { %1209 = vmatpush1.bf16.msra.mxu0 %v2789_v12  ;;  %1030 = vmatprep.mubr.bf16.mxu0 %v2798_v14  ;;  %v2902_v12 = vld [vmem:[#allocation7 + $0x54] ss:$8 sps:$4 sm:$0xff]   ;;  %v2900_v14 = vld [vmem:[#allocation7 + $0x50] ss:$8 sps:$4 sm:$0xff]  }
  0x8b   :  { %1134 = vmatmul.mubr.bf16.gmra.mxu1 %v2794_v13  ;;  %1210 = vmatprep.subr.bf16.mxu0 %v2797_v15  ;;  %v2882_v13 = vld [vmem:[#allocation2 + $0xd4] ss:$24 sps:$4 sm:$0xff]   ;;  %v2951_v10 = vld [vmem:[#allocation8 + $0x18] sm:$0xff]  }
  0x8c   :  { %1143 = vmatprep.mubr.bf16.mxu1 %v2804_v16  ;;  %1573 = vmatprep.subr.bf16.mxu1 %v2902_v12  ;;  %v2905_v15 = vld [vmem:[#allocation7 + $0x44] ss:$8 sps:$4 sm:$0xff]   ;;  %v2903_v16 = vld [vmem:[#allocation7 + $0x40] ss:$8 sps:$4 sm:$0xff]  }
  0x8d   :  { %1574 = vmatpush1.bf16.msra.mxu1 %v2900_v14 }
  0x8e   :  { %1211 = vmatpush1.bf16.msra.mxu0 %v2795_v17  ;;  %1575 = vmatprep.subr.bf16.mxu1 %v2905_v15  ;;  %v2884_v17 = vld [vmem:[#allocation2 + $0xd0] ss:$24 sps:$4 sm:$0xff]  }
  0x8f   :  { %1212 = vmatprep.subr.bf16.mxu0 %v2803_v18  ;;  %v2908_v18 = vld [vmem:[#allocation7 + $0x34] ss:$8 sps:$4 sm:$0xff]  }
  0x90   :  { %v2953_v15 = vld [vmem:[#allocation8 + $0x10] sm:$0xff]  }
  0x91   :  { %1031 = vmatmul.mubr.bf16.gmra.mxu0 %v2800_v19  ;;  %1576 = vmatpush1.bf16.msra.mxu1 %v2903_v16  ;;  %v2885_v19 = vld [vmem:[#allocation2 + $0x104] ss:$24 sps:$4 sm:$0xff]  }
  0x92   :  { %1213 = vmatpush1.bf16.msra.mxu0 %v2801_v20  ;;  %1040 = vmatprep.mubr.bf16.mxu0 %v2810_v22  ;;  %v2906_v20 = vld [vmem:[#allocation7 + $0x30] ss:$8 sps:$4 sm:$0xff]   ;;  %v2909_v22 = vld [vmem:[#allocation7 + $0x20] ss:$8 sps:$4 sm:$0xff]  }
  0x93   :  { %1144 = vmatmul.mubr.bf16.gmra.mxu1 %v2806_v21  ;;  %1214 = vmatprep.subr.bf16.mxu0 %v2809_v23  ;;  %v2911_v21 = vld [vmem:[#allocation7 + $0x24] ss:$8 sps:$4 sm:$0xff]   ;;  %v2887_v23 = vld [vmem:[#allocation2 + $0x100] ss:$24 sps:$4 sm:$0xff]  }
  0x94   :  { %1153 = vmatprep.mubr.bf16.mxu1 %v2816_v24  ;;  %1577 = vmatprep.subr.bf16.mxu1 %v2908_v18  ;;  %v2914_v24 = vld [vmem:[#allocation7 + $0x14] ss:$8 sps:$4 sm:$0xff]   ;;  %v2954_v18 = vld [vmem:[#allocation8 + $0x48] sm:$0xff]  }
  0x95   :  { %1578 = vmatpush1.bf16.msra.mxu1 %v2906_v20  ;;  %v2955_v20 = vld [vmem:[#allocation8 + $0x8] sm:$0xff]  }
  0x96   :  { %1215 = vmatpush1.bf16.msra.mxu0 %v2807_v25  ;;  %1579 = vmatprep.subr.bf16.mxu1 %v2911_v21  ;;  %v2888_v25 = vld [vmem:[#allocation2 + $0x134] ss:$24 sps:$4 sm:$0xff]  }
  0x97   :  { %1216 = vmatprep.subr.bf16.mxu0 %v2815_v26  ;;  %v2912_v26 = vld [vmem:[#allocation7 + $0x10] ss:$8 sps:$4 sm:$0xff]  }
  0x99   :  { %1041 = vmatmul.mubr.bf16.gmra.mxu0 %v2812_v27  ;;  %1580 = vmatpush1.bf16.msra.mxu1 %v2909_v22  ;;  %v2917_v27 = vld [vmem:[#allocation7 + $0x4] ss:$8 sps:$4 sm:$0xff]  }
  0x9a   :  { %1217 = vmatpush1.bf16.msra.mxu0 %v2813_v28  ;;  %1050 = vmatprep.mubr.bf16.mxu0 %v2822_v30  ;;  %v2915_v28 = vld [vmem:[#allocation7] ss:$8 sps:$4 sm:$0xff]   ;;  %v2920_v30 = vld [vmem:[#allocation7 + $0xf4] ss:$8 sps:$4 sm:$0xff]  }
  0x9b   :  { %1154 = vmatmul.mubr.bf16.gmra.mxu1 %v2818_v29  ;;  %1218 = vmatprep.subr.bf16.mxu0 %v2821_v31  ;;  %v2890_v29 = vld [vmem:[#allocation2 + $0x130] ss:$24 sps:$4 sm:$0xff]   ;;  %v2891_v31 = vld [vmem:[#allocation2 + $0x164] ss:$24 sps:$4 sm:$0xff]  }
  0x9c   :  { %1163 = vmatprep.mubr.bf16.mxu1 %v2828_v32  ;;  %1581 = vmatprep.subr.bf16.mxu1 %v2914_v24  ;;  %v2918_v32 = vld [vmem:[#allocation7 + $0xf0] ss:$8 sps:$4 sm:$0xff]  }
  0x9d   :  { %1582 = vmatpush1.bf16.msra.mxu1 %v2912_v26 }
  0x9e   :  { %1219 = vmatpush1.bf16.msra.mxu0 %v2819_v33  ;;  %1583 = vmatprep.subr.bf16.mxu1 %v2917_v27  ;;  %v2923_v33 = vld [vmem:[#allocation7 + $0xe4] ss:$8 sps:$4 sm:$0xff]  }
  0x9f   :  { %1220 = vmatprep.subr.bf16.mxu0 %v2827_v34  ;;  %v2921_v34 = vld [vmem:[#allocation7 + $0xe0] ss:$8 sps:$4 sm:$0xff]  }
  0xa1   :  { %1051 = vmatmul.mubr.bf16.gmra.mxu0 %v2824_v35  ;;  %1584 = vmatpush1.bf16.msra.mxu1 %v2915_v28  ;;  %v2893_v35 = vld [vmem:[#allocation2 + $0x160] ss:$24 sps:$4 sm:$0xff]  }
  0xa2   :  { %1221 = vmatpush2.bf16.msra.mxu0 %v2825_v36  ;;  %1060 = vmatprep.mubr.bf16.mxu0 %v2834_v39  ;;  %v2926_v36 = vld [vmem:[#allocation7 + $0xd4] ss:$8 sps:$4 sm:$0xff]   ;;  %v2927_v39 = vld [vmem:[#allocation7 + $0xc0] ss:$8 sps:$4 sm:$0xff]  }
  0xa3   :  { %1164 = vmatmul.mubr.bf16.gmra.mxu1 %v2830_v37  ;;  %1222 = vmatprep.subr.bf16.mxu0 %v2833_v38  ;;  %v2924_v37 = vld [vmem:[#allocation7 + $0xd0] ss:$8 sps:$4 sm:$0xff]   ;;  %v2929_v38 = vld [vmem:[#allocation7 + $0xc4] ss:$8 sps:$4 sm:$0xff]  }
  0xa4   :  { %1173 = vmatprep.mubr.bf16.mxu1 %v2840_v40  ;;  %1585 = vmatprep.subr.bf16.mxu1 %v2920_v30  ;;  %v2932_v40 = vld [vmem:[#allocation7 + $0xb4] ss:$8 sps:$4 sm:$0xff]  }
  0xa5   :  { %1586 = vmatpush2.bf16.msra.mxu1 %v2918_v32 }
  0xa6   :  { %1223 = vmatpush2.bf16.msra.mxu0 %v2831_v41  ;;  %1587 = vmatprep.subr.bf16.mxu1 %v2923_v33  ;;  %v2930_v41 = vld [vmem:[#allocation7 + $0xb0] ss:$8 sps:$4 sm:$0xff]  }
  0xa7   :  { %1224 = vmatprep.subr.bf16.mxu0 %v2839_v42  ;;  %v2935_v42 = vld [vmem:[#allocation7 + $0xa4] ss:$8 sps:$4 sm:$0xff]  }
  0xa9   :  { %1061 = vmatmul.mubr.bf16.gmra.mxu0 %v2836_v43  ;;  %1588 = vmatpush2.bf16.msra.mxu1 %v2921_v34  ;;  %v2933_v43 = vld [vmem:[#allocation7 + $0xa0] ss:$8 sps:$4 sm:$0xff]  }
  0xaa   :  { %1225 = vmatpush2.bf16.msra.mxu0 %v2837_v44  ;;  %1070 = vmatprep.mubr.bf16.mxu0 %v2846_v45  ;;  %v2938_v44 = vld [vmem:[#allocation7 + $0x94] ss:$8 sps:$4 sm:$0xff]   ;;  %v2936_v45 = vld [vmem:[#allocation7 + $0x90] ss:$8 sps:$4 sm:$0xff]  }
  0xab   :  { %1174 = vmatmul.mubr.bf16.gmra.mxu1 %v2842_v46  ;;  %1226 = vmatprep.subr.bf16.mxu0 %v2845_v47  ;;  %v2941_v46 = vld [vmem:[#allocation7 + $0x84] ss:$8 sps:$4 sm:$0xff]   ;;  %v2939_v47 = vld [vmem:[#allocation7 + $0x80] ss:$8 sps:$4 sm:$0xff]  }
  0xac   :  { %1183 = vmatprep.mubr.bf16.mxu1 %v2852_v48  ;;  %1589 = vmatprep.subr.bf16.mxu1 %v2926_v36 }
  0xad   :  { %1590 = vmatpush2.bf16.msra.mxu1 %v2924_v37 }
  0xae   :  { %1227 = vmatpush2.bf16.msra.mxu0 %v2843_v49  ;;  %1591 = vmatprep.subr.bf16.mxu1 %v2929_v38 }
  0xaf   :  { %1228 = vmatprep.subr.bf16.mxu0 %v2851_v50 }
  0xb1   :  { %1071 = vmatmul.mubr.bf16.gmra.mxu0 %v2848_v51  ;;  %1592 = vmatpush2.bf16.msra.mxu1 %v2927_v39 }
  0xb2   :  { %1229 = vmatpush2.bf16.msra.mxu0 %v2849_v52  ;;  %1080 = vmatprep.mubr.bf16.mxu0 %v2858_v53 }
  0xb3   :  { %1184 = vmatmul.mubr.bf16.gmra.mxu1 %v2854_v54  ;;  %1230 = vmatprep.subr.bf16.mxu0 %v2857_v55  ;;  %v2942_v55 = vld [vmem:[#allocation8 + $0x78] sm:$0xff]  }
  0xb4   :  { %1193 = vmatprep.mubr.bf16.mxu1 %v2864_v56  ;;  %1593 = vmatprep.subr.bf16.mxu1 %v2932_v40  ;;  %v2943_v56 = vld [vmem:[#allocation8 + $0x38] sm:$0xff]  }
  0xb5   :  { %1594 = vmatpush2.bf16.msra.mxu1 %v2930_v41 }
  0xb6   :  { %1231 = vmatpush2.bf16.msra.mxu0 %v2855_v57  ;;  %1595 = vmatprep.subr.bf16.mxu1 %v2935_v42  ;;  %v2944_v57 = vld [vmem:[#allocation8 + $0x70] sm:$0xff]  }
  0xb7   :  { %1232 = vmatprep.subr.bf16.mxu0 %v2863_v58 }
  0xb9   :  { %1081 = vmatmul.mubr.bf16.gmra.mxu0 %v2860_v59  ;;  %1596 = vmatpush2.bf16.msra.mxu1 %v2933_v43  ;;  %v2945_v59 = vld [vmem:[#allocation8 + $0x30] sm:$0xff]  }
  0xba   :  { %1233 = vmatpush2.bf16.msra.mxu0 %v2861_v60  ;;  %1236 = vmatprep.mubr.bf16.mxu0 %v2872_v61 }
  0xbb   :  { %1194 = vmatmul.mubr.bf16.gmra.mxu1 %v2866_v62  ;;  %1234 = vmatprep.subr.bf16.mxu0 %v2869_v63  ;;  %v2946_v62 = vld [vmem:[#allocation8 + $0x68] sm:$0xff]  }
  0xbc   :  { %1597 = vmatprep.subr.bf16.mxu1 %v2938_v44 }
  0xbd   :  { %1598 = vmatpush2.bf16.msra.mxu1 %v2936_v45 }
  0xbe   :  { %1235 = vmatpush2.bf16.msra.mxu0 %v2867_v0  ;;  %1599 = vmatprep.subr.bf16.mxu1 %v2941_v46  ;;  %v2947_v0 = vld [vmem:[#allocation8 + $0x28] sm:$0xff]   ;;  %v246_v46 = vld [vmem:[%s3698_s2] sm:$0x3] }
  0xbf   :  { %2554 = vmatprep.subr.bf16.mxu0 %v2942_v55 }
  0xc1   :  { %1237 = vmatmul.mubr.bf16.vlgmr.msra.gmra.mxu0 %v2870_v1  ;;  %1600 = vmatpush2.bf16.msra.mxu1 %v2939_v47 }
  0xc2   :  { %1246 = vmatprep.mubr.bf16.mxu0 %v2873_v2  ;;  %2555 = vmatpush3.bf16.msra.mxu0 %v2943_v56 }
  0xc3   :  { %2556 = vmatprep.subr.bf16.mxu0 %v2944_v57 }
  0xc6   :  { %2557 = vmatpush3.bf16.msra.mxu0 %v2945_v59 }
  0xc7   :  { %2558 = vmatprep.subr.bf16.mxu0 %v2946_v62 }
  0xc9   :  { %1247 = vmatmul.mubr.bf16.gmra.mxu0 %v2875_v3  ;;  %v2948_v3 = vld [vmem:[#allocation8 + $0x60] sm:$0xff]  }
  0xca   :  { %1256 = vmatprep.mubr.bf16.mxu0 %v2876_v4  ;;  %2559 = vmatpush3.bf16.msra.mxu0 %v2947_v0 }
  0xcb   :  { %2560 = vmatprep.subr.bf16.mxu0 %v2948_v3 }
  0xd1   :  { %1257 = vmatmul.mubr.bf16.gmra.mxu0 %v2878_v5  ;;  %v2949_v5 = vld [vmem:[#allocation8 + $0x20] sm:$0xff]  }
  0xd2   :  { %1266 = vmatprep.mubr.bf16.mxu0 %v2879_v7  ;;  %2561 = vmatpush3.bf16.msra.mxu0 %v2949_v5 }
  0xd3   :  { %2562 = vmatprep.subr.bf16.mxu0 %v2950_v8 }
  0xd6   :  { %2563 = vmatpush3.bf16.msra.mxu0 %v2951_v10 }
  0xd9   :  { %1267 = vmatmul.mubr.bf16.gmra.mxu0 %v2881_v11 }
  0xda   :  { %1276 = vmatprep.mubr.bf16.mxu0 %v2882_v13  ;;  %v2952_v13 = vld [vmem:[#allocation8 + $0x50] sm:$0xff]  }
  0xdb   :  { %2564 = vmatprep.subr.bf16.mxu0 %v2952_v13 }
  0xdc   :  { %2565 = vmatpush3.bf16.msra.mxu0 %v2953_v15 }
  0xdd   :  { %2566 = vmatprep.subr.bf16.mxu0 %v2954_v18 }
  0xe0   :  { %2567 = vmatpush3.bf16.msra.mxu0 %v2955_v20 }
  0xe1   :  { %1277 = vmatmul.mubr.bf16.gmra.mxu0 %v2884_v17 }
  0xe2   :  { %1286 = vmatprep.mubr.bf16.mxu0 %v2885_v19 }
  0xe9   :  { %1287 = vmatmul.mubr.bf16.gmra.mxu0 %v2887_v23 }
  0xea   :  { %1296 = vmatprep.mubr.bf16.mxu0 %v2888_v25 }
  0xf1   :  { %1297 = vmatmul.mubr.bf16.gmra.mxu0 %v2890_v29 }
  0xf2   :  { %1306 = vmatprep.mubr.bf16.mxu0 %v2891_v31 }
  0xf9   :  { %1307 = vmatmul.mubr.bf16.gmra.mxu0 %v2893_v35  ;;  %v3706_v35 = vlaneseq }
  0xfb   :  { %v3328_v39 = vshrl.u32 %v3706_v35, 7 }
  0xfd   :  { %3711 = vst [vmem:[#allocation16_spill] sm:$0xff] %v3328_v39  ;;  %v3708_v43 = vsub.s32 1, %v3328_v39  ;;  %v3707_v44 = vsub.s32 0, %v3328_v39 }
  0xff   :  { %v3349_v56 = vrot.slane %v246_v46, %v3708_v43  ;;  %v3353_v57 = vrot.slane %v246_v46, %v3707_v44 }
 0x141   :  { %v3247_v48 = vpop.f32.mrf.mxu0 }
 0x142   :  { %v1013_v8 = vadd.f32 %v3247_v48, %v3353_v57 }
 0x143   :  { %v3249_v49 = vpop.f32.mrf.mxu0  ;;  %v3251_v50 = vpop.f32.mrf.mxu1 }
 0x144   :  { %v1015_v3 = vadd.f32 %v3249_v49, %v3349_v56  ;;  %v1126_v35 = vadd.f32 %v3251_v50, %v1013_v8 }
 0x145   :  { %v3253_v51 = vpop.f32.mrf.mxu0  ;;  %v3255_v52 = vpop.f32.mrf.mxu1 }
 0x146   :  { %v1017_v5 = vadd.f32 %v3253_v51, %v3353_v57  ;;  %v1128_v20 = vadd.f32 %v3255_v52, %v1015_v3 }
 0x147   :  { %v3257_v53 = vpop.f32.mrf.mxu0  ;;  %v3259_v54 = vpop.f32.mrf.mxu1 }
 0x148   :  { %v1019_v13 = vadd.f32 %v3257_v53, %v3349_v56  ;;  %v1130_v46 = vadd.f32 %v3259_v54, %v1017_v5 }
 0x149   :  { %v3261_v58 = vpop.f32.mrf.mxu0  ;;  %v3263_v60 = vpop.f32.mrf.mxu1 }
 0x14a   :  { %v1132_v44 = vadd.f32 %v3263_v60, %v1019_v13  ;;  %v1023_v54 = vadd.f32 %v3261_v58, %v3353_v57 }
 0x14b   :  { %v3265_v61 = vpop.f32.mrf.mxu0  ;;  %v3269_v1 = vpop.f32.mrf.mxu1 }
 0x14c   :  { %v1025_v53 = vadd.f32 %v3265_v61, %v3349_v56 }
 0x14d   :  { %v3267_v63 = vpop.f32.mrf.mxu0  ;;  %v3275_v6 = vpop.f32.mrf.mxu1 }
 0x14e   :  { %v1138_v61 = vadd.f32 %v3275_v6, %v1025_v53 }
 0x14f   :  { %v3271_v2 = vpop.f32.mrf.mxu0  ;;  %v3281_v11 = vpop.f32.mrf.mxu1 }
 0x150   :  { %v1029_v60 = vadd.f32 %v3271_v2, %v3349_v56 }
 0x151   :  { %v3273_v4 = vpop.f32.mrf.mxu0  ;;  %v3287_v16 = vpop.f32.mrf.mxu1 }
 0x153   :  { %v3277_v7 = vpop.f32.mrf.mxu0  ;;  %v3293_v21 = vpop.f32.mrf.mxu1 }
 0x154   :  { %v1035_v6 = vadd.f32 %v3277_v7, %v3349_v56 }
 0x155   :  { %v3279_v9 = vpop.f32.mrf.mxu0  ;;  %v3299_v24 = vpop.f32.mrf.mxu1 }
 0x156   :  { %v1148_v7 = vadd.f32 %v3299_v24, %v1035_v6 }
 0x157   :  { %v3283_v12 = vpop.f32.mrf.mxu0  ;;  %v3305_v27 = vpop.f32.mrf.mxu1 }
 0x158   :  { %v1039_v53 = vadd.f32 %v3283_v12, %v3349_v56 }
 0x159   :  { %v3285_v14 = vpop.f32.mrf.mxu0  ;;  %v3311_v30 = vpop.f32.mrf.mxu1 }
 0x15b   :  { %v3289_v17 = vpop.f32.mrf.mxu0  ;;  %v3317_v33 = vpop.f32.mrf.mxu1 }
 0x15c   :  { %v1045_v24 = vadd.f32 %v3289_v17, %v3349_v56 }
 0x15d   :  { %v3291_v19 = vpop.f32.mrf.mxu0  ;;  %v3323_v37 = vpop.f32.mrf.mxu1 }
 0x15f   :  { %v3295_v22 = vpop.f32.mrf.mxu0  ;;  %v3332_v41 = vpop.f32.mrf.mxu1 }
 0x161   :  { %v3297_v23 = vpop.f32.mrf.mxu0  ;;  %v3343_v47 = vpop.f32.mrf.mxu1 }
 0x163   :  { %v3301_v25 = vpop.f32.mrf.mxu0  ;;  %v3357_v62 = vpop.f32.mrf.mxu1 }
 0x165   :  { %v3303_v26 = vpop.f32.mrf.mxu0  ;;  %v3369_v15 = vpop.f32.mrf.mxu1 }
 0x167   :  { %v3307_v28 = vpop.f32.mrf.mxu0  ;;  %v3375_v39 = vpop.f32.mrf.mxu1 }
 0x169   :  { %v3309_v29 = vpop.f32.mrf.mxu0  ;;  %v3385_v13 = vpop.f32.mrf.mxu1 }
 0x16b   :  { %v3313_v31 = vpop.f32.mrf.mxu0  ;;  %v3391_v2 = vpop.f32.mrf.mxu1 }
 0x16d   :  { %v3315_v32 = vpop.f32.mrf.mxu0 }
 0x16f   :  { %v3319_v34 = vpop.f32.mrf.mxu0 }
 0x171   :  { %v3321_v36 = vpop.f32.mrf.mxu0 }
 0x173   :  { %v3325_v38 = vpop.f32.mrf.mxu0 }
 0x175   :  { %v3330_v40 = vpop.f32.mrf.mxu0 }
 0x177   :  { %v3334_v42 = vpop.f32.mrf.mxu0 }
 0x179   :  { %v3338_v45 = vpop.f32.mrf.mxu0 }
 0x17a   :  { %3712 = vst [vmem:[#allocation17_spill] sm:$0xff] %v3338_v45  ;;  %v1027_v45 = vadd.f32 %v3267_v63, %v3353_v57 }
 0x17b   :  { %v3345_v55 = vpop.f32.mrf.mxu0 }
 0x17d   :  { %v3355_v59 = vpop.f32.mrf.mxu0 }
 0x17f   :  { %v3359_v0 = vpop.f32.mrf.mxu0 }
 0x180   :  { %3713 = vst [vmem:[#allocation18_spill] sm:$0xff] %v3359_v0 }
 0x181   :  { %v1238_v10 = vpop.f32.mrf.mxu0 }
 0x182   :  { %v1239_v48 = vadd.f32 %v1238_v10, %v1126_v35 }
 0x183   :  { %v1240_v18 = vpop.f32.mrf.mxu0 }
 0x184   :  { %v1241_v51 = vadd.f32 %v1240_v18, %v1128_v20  ;;  %v1317_v35 = vmax.f32 %v1239_v48, 0.0  ;;  %v1140_v18 = vadd.f32 %v3281_v11, %v1027_v45  ;;  %v1037_v11 = vadd.f32 %v3279_v9, %v3353_v57 }
 0x185   :  { %v1242_v49 = vpop.f32.mrf.mxu0 }
 0x186   :  { %v1243_v43 = vadd.f32 %v1242_v49, %v1130_v46  ;;  %v1318_v5 = vmax.f32 %v1241_v51, 0.0 }
 0x187   :  { %v1244_v0 = vpop.f32.mrf.mxu0 }
 0x188   :  { %v1245_v52 = vadd.f32 %v1244_v0, %v1132_v44  ;;  %v1319_v50 = vmax.f32 %v1243_v43, 0.0  ;;  %v1136_v44 = vadd.f32 %v3269_v1, %v1023_v54  ;;  %v1142_v43 = vadd.f32 %v3287_v16, %v1029_v60 }
 0x189   :  { %v1248_v3 = vpop.f32.mrf.mxu0  ;;  %v1033_v1 = vadd.f32 %v3273_v4, %v3353_v57 }
 0x18a   :  { %v1320_v8 = vmax.f32 %v1245_v52, 0.0  ;;  %v1349_v0 = vpack.c.bf16 %v1319_v50, %v1317_v35  ;;  %v1249_v49 = vadd.f32 %v1248_v3, %v1136_v44  ;;  %v3401_v50 = vpop.f32.mrf.mxu1 }
 0x18b   :  { %v1250_v10 = vpop.f32.mrf.mxu0 }
 0x18c   :  { %v1350_v63 = vpack.c.bf16 %v1320_v8, %v1318_v5  ;;  %v1251_v20 = vadd.f32 %v1250_v10, %v1138_v61  ;;  %v1321_v3 = vmax.f32 %v1249_v49, 0.0  ;;  %v1150_v5 = vadd.f32 %v3305_v27, %v1037_v11  ;;  %v3407_v12 = vpop.f32.mrf.mxu1 }
 0x18d   :  { %v1252_v58 = vpop.f32.mrf.mxu0  ;;  %v1146_v8 = vadd.f32 %v3293_v21, %v1033_v1  ;;  %v1152_v10 = vadd.f32 %v3311_v30, %v1039_v53  ;;  %v1047_v27 = vadd.f32 %v3291_v19, %v3353_v57  ;;  %v1043_v21 = vadd.f32 %v3285_v14, %v3353_v57 }
 0x18e   :  { %v1253_v46 = vadd.f32 %v1252_v58, %v1140_v18  ;;  %1601 = vmatprep.mubr.bf16.mxu1 %v1350_v63  ;;  %v1322_v52 = vmax.f32 %v1251_v20, 0.0  ;;  %v1181_v49 = vpop.f32.mrf.mxu1  ;;  %v1158_v11 = vadd.f32 %v3323_v37, %v1045_v24  ;;  %v1055_v37 = vadd.f32 %v3301_v25, %v3349_v56 }
 0x18f   :  { %v1254_v51 = vpop.f32.mrf.mxu0  ;;  %1602 = vmatmul.mubr.bf16.vlgmr.msra.gmra.mxu1 %v1349_v0  ;;  %v1160_v17 = vadd.f32 %v3332_v41, %v1047_v27  ;;  %v1156_v19 = vadd.f32 %v3317_v33, %v1043_v21  ;;  %v1057_v41 = vadd.f32 %v3303_v26, %v3353_v57  ;;  %v1053_v33 = vadd.f32 %v3297_v23, %v3353_v57 }
 0x190   :  { %v1255_v45 = vadd.f32 %v1254_v51, %v1142_v43  ;;  %v1323_v48 = vmax.f32 %v1253_v46, 0.0  ;;  %v1049_v43 = vadd.f32 %v3295_v22, %v3349_v56  ;;  %v3421_v22 = vpop.f32.mrf.mxu1  ;;  %v1065_v21 = vadd.f32 %v3313_v31, %v3349_v56 }
 0x191   :  { %v1258_v16 = vpop.f32.mrf.mxu0  ;;  %v1170_v25 = vadd.f32 %v3375_v39, %v1057_v41  ;;  %v1166_v26 = vadd.f32 %v3357_v62, %v1053_v33  ;;  %v1067_v39 = vadd.f32 %v3315_v32, %v3353_v57  ;;  %v1063_v62 = vadd.f32 %v3309_v29, %v3353_v57 }
 0x192   :  { %v1324_v54 = vmax.f32 %v1255_v45, 0.0  ;;  %v1351_v35 = vpack.c.bf16 %v1323_v48, %v1321_v3  ;;  %v1259_v63 = vadd.f32 %v1258_v16, %v1146_v8  ;;  %v1162_v14 = vadd.f32 %v3343_v47, %v1049_v43  ;;  %v1187_v8 = vpop.f32.mrf.mxu1 }
 0x193   :  { %v1260_v60 = vpop.f32.mrf.mxu0  ;;  %v1180_v31 = vadd.f32 %v3407_v12, %v1067_v39  ;;  %v1176_v32 = vadd.f32 %v3391_v2, %v1063_v62  ;;  %v1073_v2 = vadd.f32 %v3321_v36, %v3353_v57 }
 0x194   :  { %v1352_v9 = vpack.c.bf16 %v1324_v54, %v1322_v52  ;;  %v1261_v61 = vadd.f32 %v1260_v60, %v1148_v7  ;;  %v1325_v51 = vmax.f32 %v1259_v63, 0.0  ;;  %v1059_v7 = vadd.f32 %v3307_v28, %v3349_v56  ;;  %v1189_v28 = vpop.f32.mrf.mxu1 }
 0x195   :  { %v1262_v4 = vpop.f32.mrf.mxu0 }
 0x196   :  { %v1263_v18 = vadd.f32 %v1262_v4, %v1150_v5  ;;  %1611 = vmatprep.mubr.bf16.mxu1 %v1352_v9  ;;  %v1326_v20 = vmax.f32 %v1261_v61, 0.0  ;;  %v1172_v23 = vadd.f32 %v3385_v13, %v1059_v7  ;;  %v1069_v13 = vadd.f32 %v3319_v34, %v3349_v56 }
 0x197   :  { %v1264_v44 = vpop.f32.mrf.mxu0  ;;  %1612 = vmatmul.mubr.bf16.gmra.mxu1 %v1351_v35 }
 0x198   :  { %v1265_v0 = vadd.f32 %v1264_v44, %v1152_v10  ;;  %v1327_v58 = vmax.f32 %v1263_v18, 0.0  ;;  %v1168_v10 = vadd.f32 %v3369_v15, %v1055_v37  ;;  %v1182_v29 = vadd.f32 %v1181_v49, %v1069_v13 }
 0x199   :  { %v1268_v30 = vpop.f32.mrf.mxu0  ;;  %v1079_v49 = vadd.f32 %v3334_v42, %v3349_v56  ;;  %v1085_v42 = vadd.f32 %v3345_v55, %v3349_v56 }
 0x19a   :  { %v1328_v46 = vmax.f32 %v1265_v0, 0.0  ;;  %v1353_v1 = vpack.c.bf16 %v1327_v58, %v1325_v51  ;;  %v1269_v52 = vadd.f32 %v1268_v30, %v1156_v19 }
 0x19b   :  { %v1270_v6 = vpop.f32.mrf.mxu0 }
 0x19c   :  { %v1354_v45 = vpack.c.bf16 %v1328_v46, %v1326_v20  ;;  %v1271_v16 = vadd.f32 %v1270_v6, %v1158_v11  ;;  %v1329_v35 = vmax.f32 %v1269_v52, 0.0  ;;  %v1191_v46 = vpop.f32.mrf.mxu1  ;;  %v1178_v11 = vadd.f32 %v3401_v50, %v1065_v21 }
 0x19d   :  { %v1272_v48 = vpop.f32.mrf.mxu0  ;;  %v1077_v50 = vadd.f32 %v3330_v40, %v3353_v57 }
 0x19e   :  { %v1273_v53 = vadd.f32 %v1272_v48, %v1160_v17  ;;  %1621 = vmatprep.mubr.bf16.mxu1 %v1354_v45  ;;  %v1330_v5 = vmax.f32 %v1271_v16, 0.0 }
 0x19f   :  { %v1274_v54 = vpop.f32.mrf.mxu0  ;;  %1622 = vmatmul.mubr.bf16.gmra.mxu1 %v1353_v1  ;;  %v1190_v7 = vadd.f32 %v1189_v28, %v1077_v50 }
 0x1a0   :  { %v1275_v3 = vadd.f32 %v1274_v54, %v1162_v14  ;;  %v1331_v60 = vmax.f32 %v1273_v53, 0.0  ;;  %v1195_v14 = vpop.f32.mrf.mxu1  ;;  %v1075_v53 = vadd.f32 %v3325_v38, %v3349_v56 }
 0x1a1   :  { %v1278_v47 = vpop.f32.mrf.mxu0 }
 0x1a2   :  { %v1332_v9 = vmax.f32 %v1275_v3, 0.0  ;;  %v1355_v18 = vpack.c.bf16 %v1331_v60, %v1329_v35  ;;  %v1279_v27 = vadd.f32 %v1278_v47, %v1166_v26  ;;  %v1197_v3 = vpop.f32.mrf.mxu1  ;;  %v1188_v47 = vadd.f32 %v1187_v8, %v1075_v53 }
 0x1a3   :  { %v1280_v4 = vpop.f32.mrf.mxu0  ;;  %v1192_v35 = vadd.f32 %v1191_v46, %v1079_v49  ;;  %v1087_v8 = vadd.f32 %v3355_v59, %v3353_v57 }
 0x1a4   :  { %v1356_v61 = vpack.c.bf16 %v1332_v9, %v1330_v5  ;;  %v1281_v44 = vadd.f32 %v1280_v4, %v1168_v10  ;;  %v1333_v51 = vmax.f32 %v1279_v27, 0.0  ;;  %v1186_v5 = vadd.f32 %v3421_v22, %v1073_v2  ;;  %v1199_v10 = vpop.f32.mrf.mxu1 }
 0x1a5   :  { %v1282_v63 = vpop.f32.mrf.mxu0  ;;  %v1200_v62 = vadd.f32 %v1199_v10, %v1087_v8 }
 0x1a6   :  { %v1283_v24 = vadd.f32 %v1282_v63, %v1170_v25  ;;  %1631 = vmatprep.mubr.bf16.mxu1 %v1356_v61  ;;  %v1334_v43 = vmax.f32 %v1281_v44, 0.0  ;;  %v3715_v44 = vld [vmem:[#allocation18_spill] sm:$0xff] }
 0x1a7   :  { %v1284_v0 = vpop.f32.mrf.mxu0  ;;  %1632 = vmatmul.mubr.bf16.gmra.mxu1 %v1355_v18  ;;  %v3714_v18 = vld [vmem:[#allocation17_spill] sm:$0xff] }
 0x1a8   :  { %v1285_v15 = vadd.f32 %v1284_v0, %v1172_v23  ;;  %v1335_v58 = vmax.f32 %v1283_v24, 0.0  ;;  %v1083_v22 = vadd.f32 %v3714_v18, %v3353_v57  ;;  %v1089_v24 = vadd.f32 %v3715_v44, %v3349_v56  ;;  %v1201_v0 = vpop.f32.mrf.mxu1 }
 0x1a9   :  { %v1288_v30 = vpop.f32.mrf.mxu0 }
 0x1aa   :  { %v1336_v20 = vmax.f32 %v1285_v15, 0.0  ;;  %v1357_v45 = vpack.c.bf16 %v1335_v58, %v1333_v51  ;;  %v1289_v34 = vadd.f32 %v1288_v30, %v1176_v32  ;;  %v1198_v15 = vadd.f32 %v1197_v3, %v1085_v42 }
 0x1ab   :  { %v1290_v6 = vpop.f32.mrf.mxu0  ;;  %v1196_v58 = vadd.f32 %v1195_v14, %v1083_v22  ;;  %v1202_v13 = vadd.f32 %v1201_v0, %v1089_v24  ;;  %v1397_v14 = vld [vmem:[%s3700_s4] sm:$0x3] }
 0x1ac   :  { %v1358_v17 = vpack.c.bf16 %v1336_v20, %v1334_v43  ;;  %v1291_v1 = vadd.f32 %v1290_v6, %v1178_v11  ;;  %v1337_v33 = vmax.f32 %v1289_v34, 0.0 }
 0x1ad   :  { %v1292_v19 = vpop.f32.mrf.mxu0 }
 0x1ae   :  { %v1293_v48 = vadd.f32 %v1292_v19, %v1180_v31  ;;  %1641 = vmatprep.mubr.bf16.mxu1 %v1358_v17  ;;  %v1338_v37 = vmax.f32 %v1291_v1, 0.0  ;;  %v2957_v19 = vld [vmem:[#allocation8] sm:$0xff]   ;;  %v2959_v1 = vld [vmem:[#allocation10 + $0x30] sm:$0xff]  }
 0x1af   :  { %v1294_v16 = vpop.f32.mrf.mxu0  ;;  %1642 = vmatmul.mubr.bf16.gmra.mxu1 %v1357_v45  ;;  %v2956_v45 = vld [vmem:[#allocation8 + $0x40] sm:$0xff]  }
 0x1b0   :  { %v1295_v12 = vadd.f32 %v1294_v16, %v1182_v29  ;;  %v1339_v52 = vmax.f32 %v1293_v48, 0.0  ;;  %2568 = vmatprep.subr.bf16.mxu0 %v2956_v45  ;;  %v2958_v29 = vld [vmem:[#allocation10 + $0x38] sm:$0xff]   ;;  %v2960_v48 = vld [vmem:[#allocation10 + $0x28] sm:$0xff]   ;;  %v3716_v16 = vld [vmem:[#allocation16_spill] sm:$0xff] }
 0x1b1   :  { %v1298_v54 = vpop.f32.mrf.mxu0  ;;  %2569 = vmatpush3.bf16.msra.mxu0 %v2957_v19  ;;  %2634 = vmatprep.subr.bf16.mxu1 %v2958_v29  ;;  %v3717_v53 = vsub.s32 1, %v3716_v16 }
 0x1b2   :  { %v1340_v41 = vmax.f32 %v1295_v12, 0.0  ;;  %v1359_v40 = vpack.c.bf16 %v1339_v52, %v1337_v33  ;;  %v1299_v25 = vadd.f32 %v1298_v54, %v1186_v5  ;;  %2635 = vmatpush3.bf16.msra.mxu1 %v2958_v29  ;;  %v3718_v12 = vsub.s32 0, %v3716_v16 }
 0x1b3   :  { %v1300_v60 = vpop.f32.mrf.mxu0  ;;  %2636 = vmatprep.subr.bf16.mxu1 %v2959_v1  ;;  %v3468_v50 = vrot.slane %v1397_v14, %v3717_v53 }
 0x1b4   :  { %v1360_v38 = vpack.c.bf16 %v1340_v41, %v1338_v37  ;;  %v1301_v4 = vadd.f32 %v1300_v60, %v1188_v47  ;;  %v1341_v21 = vmax.f32 %v1299_v25, 0.0  ;;  %v3472_v2 = vrot.slane %v1397_v14, %v3718_v12 }
 0x1b5   :  { %v1302_v9 = vpop.f32.mrf.mxu0 }
 0x1b6   :  { %v1303_v36 = vadd.f32 %v1302_v9, %v1190_v7  ;;  %1651 = vmatprep.mubr.bf16.mxu1 %v1360_v38  ;;  %v1342_v28 = vmax.f32 %v1301_v4, 0.0  ;;  %2637 = vmatpush3.bf16.msra.mxu1 %v2959_v1 }
 0x1b7   :  { %v1304_v61 = vpop.f32.mrf.mxu0  ;;  %1652 = vmatmul.mubr.bf16.gmra.mxu1 %v1359_v40  ;;  %2638 = vmatprep.subr.bf16.mxu1 %v2960_v48 }
 0x1b8   :  { %v1305_v26 = vadd.f32 %v1304_v61, %v1192_v35  ;;  %v1343_v63 = vmax.f32 %v1303_v36, 0.0 }
 0x1b9   :  { %v1308_v23 = vpop.f32.mrf.mxu0 }
 0x1ba   :  { %v1344_v27 = vmax.f32 %v1305_v26, 0.0  ;;  %v1361_v30 = vpack.c.bf16 %v1343_v63, %v1341_v21  ;;  %v1309_v57 = vadd.f32 %v1308_v23, %v1196_v58  ;;  %2639 = vmatpush3.bf16.msra.mxu1 %v2960_v48 }
 0x1bb   :  { %v1310_v39 = vpop.f32.mrf.mxu0 }
 0x1bc   :  { %v1362_v55 = vpack.c.bf16 %v1344_v27, %v1342_v28  ;;  %v1311_v43 = vadd.f32 %v1310_v39, %v1198_v15  ;;  %v1345_v31 = vmax.f32 %v1309_v57, 0.0 }
 0x1bd   :  { %v1312_v59 = vpop.f32.mrf.mxu0 }
 0x1be   :  { %v1313_v20 = vadd.f32 %v1312_v59, %v1200_v62  ;;  %1661 = vmatprep.mubr.bf16.mxu1 %v1362_v55  ;;  %v1346_v6 = vmax.f32 %v1311_v43, 0.0 }
 0x1bf   :  { %v1314_v46 = vpop.f32.mrf.mxu0  ;;  %1662 = vmatmul.mubr.bf16.gmra.mxu1 %v1361_v30 }
 0x1c0   :  { %v1315_v51 = vadd.f32 %v1314_v46, %v1202_v13  ;;  %v1347_v56 = vmax.f32 %v1313_v20, 0.0 }
 0x1c2   :  { %v1348_v11 = vmax.f32 %v1315_v51, 0.0  ;;  %v1363_v32 = vpack.c.bf16 %v1347_v56, %v1345_v31 }
 0x1c4   :  { %v1364_v17 = vpack.c.bf16 %v1348_v11, %v1346_v6 }
 0x1c6   :  { %1671 = vmatprep.mubr.bf16.mxu1 %v1364_v17 }
 0x1c7   :  { %1672 = vmatmul.mubr.bf16.gmra.mxu1 %v1363_v32 }
 0x24f   :  { %v1603_v34 = vpop.f32.mrf.mxu1 }
 0x250   :  { %v1604_v41 = vadd.f32 %v1603_v34, %v3472_v2 }
 0x251   :  { %v1605_v52 = vpop.f32.mrf.mxu1 }
 0x252   :  { %v1606_v49 = vadd.f32 %v1605_v52, %v3468_v50  ;;  %v1682_v5 = vmax.f32 %v1604_v41, 0.0 }
 0x253   :  { %v1607_v54 = vpop.f32.mrf.mxu1 }
 0x254   :  { %v1608_v37 = vadd.f32 %v1607_v54, %v3472_v2  ;;  %v1683_v7 = vmax.f32 %v1606_v49, 0.0 }
 0x255   :  { %v1609_v3 = vpop.f32.mrf.mxu1 }
 0x256   :  { %v1610_v33 = vadd.f32 %v1609_v3, %v3468_v50  ;;  %v1684_v60 = vmax.f32 %v1608_v37, 0.0 }
 0x257   :  { %v1613_v47 = vpop.f32.mrf.mxu1 }
 0x258   :  { %v1685_v38 = vmax.f32 %v1610_v33, 0.0  ;;  %v1714_v35 = vpack.c.bf16 %v1684_v60, %v1682_v5  ;;  %v1614_v25 = vadd.f32 %v1613_v47, %v3472_v2 }
 0x259   :  { %v1615_v40 = vpop.f32.mrf.mxu1 }
 0x25a   :  { %v1715_v9 = vpack.c.bf16 %v1685_v38, %v1683_v7  ;;  %v1616_v36 = vadd.f32 %v1615_v40, %v3468_v50  ;;  %v1686_v63 = vmax.f32 %v1614_v25, 0.0 }
 0x25b   :  { %v1617_v4 = vpop.f32.mrf.mxu1 }
 0x25c   :  { %v1618_v10 = vadd.f32 %v1617_v4, %v3472_v2  ;;  %1897 = vmatprep.mubr.bf16.mxu0 %v1715_v9  ;;  %v1687_v18 = vmax.f32 %v1616_v36, 0.0 }
 0x25d   :  { %v1619_v61 = vpop.f32.mrf.mxu1  ;;  %1898 = vmatmul.mubr.bf16.vlgmr.msra.gmra.mxu0 %v1714_v35 }
 0x25e   :  { %v1620_v42 = vadd.f32 %v1619_v61, %v3468_v50  ;;  %v1688_v8 = vmax.f32 %v1618_v10, 0.0 }
 0x25f   :  { %v1623_v26 = vpop.f32.mrf.mxu1 }
 0x260   :  { %v1689_v22 = vmax.f32 %v1620_v42, 0.0  ;;  %v1716_v24 = vpack.c.bf16 %v1688_v8, %v1686_v63  ;;  %v1624_v21 = vadd.f32 %v1623_v26, %v3472_v2 }
 0x261   :  { %v1625_v23 = vpop.f32.mrf.mxu1 }
 0x262   :  { %v1717_v44 = vpack.c.bf16 %v1689_v22, %v1687_v18  ;;  %v1626_v27 = vadd.f32 %v1625_v23, %v3468_v50  ;;  %v1690_v59 = vmax.f32 %v1624_v21, 0.0 }
 0x263   :  { %v1627_v28 = vpop.f32.mrf.mxu1 }
 0x264   :  { %v1628_v0 = vadd.f32 %v1627_v28, %v3472_v2  ;;  %1905 = vmatprep.mubr.bf16.mxu0 %v1717_v44  ;;  %v1691_v58 = vmax.f32 %v1626_v27, 0.0 }
 0x265   :  { %v1629_v39 = vpop.f32.mrf.mxu1  ;;  %1906 = vmatmul.mubr.bf16.gmra.mxu0 %v1716_v24 }
 0x266   :  { %v1630_v15 = vadd.f32 %v1629_v39, %v3468_v50  ;;  %v1692_v62 = vmax.f32 %v1628_v0, 0.0 }
 0x267   :  { %v1633_v55 = vpop.f32.mrf.mxu1 }
 0x268   :  { %v1693_v30 = vmax.f32 %v1630_v15, 0.0  ;;  %v1718_v20 = vpack.c.bf16 %v1692_v62, %v1690_v59  ;;  %v1634_v56 = vadd.f32 %v1633_v55, %v3472_v2 }
 0x269   :  { %v1635_v13 = vpop.f32.mrf.mxu1 }
 0x26a   :  { %v1719_v43 = vpack.c.bf16 %v1693_v30, %v1691_v58  ;;  %v1636_v46 = vadd.f32 %v1635_v13, %v3468_v50  ;;  %v1694_v19 = vmax.f32 %v1634_v56, 0.0 }
 0x26b   :  { %v1637_v57 = vpop.f32.mrf.mxu1 }
 0x26c   :  { %v1638_v51 = vadd.f32 %v1637_v57, %v3472_v2  ;;  %1913 = vmatprep.mubr.bf16.mxu0 %v1719_v43  ;;  %v1695_v32 = vmax.f32 %v1636_v46, 0.0 }
 0x26d   :  { %v1639_v6 = vpop.f32.mrf.mxu1  ;;  %1914 = vmatmul.mubr.bf16.gmra.mxu0 %v1718_v20 }
 0x26e   :  { %v1640_v11 = vadd.f32 %v1639_v6, %v3468_v50  ;;  %v1696_v31 = vmax.f32 %v1638_v51, 0.0 }
 0x26f   :  { %v1643_v17 = vpop.f32.mrf.mxu1 }
 0x270   :  { %v1697_v45 = vmax.f32 %v1640_v11, 0.0  ;;  %v1720_v48 = vpack.c.bf16 %v1696_v31, %v1694_v19  ;;  %v1644_v53 = vadd.f32 %v1643_v17, %v3472_v2  ;;  %v2961_v31 = vld [vmem:[#allocation10 + $0x20] sm:$0xff]   ;;  %v2962_v17 = vld [vmem:[#allocation10 + $0x18] sm:$0xff]  }
 0x271   :  { %v1645_v29 = vpop.f32.mrf.mxu1  ;;  %2640 = vmatprep.subr.bf16.mxu1 %v2961_v31 }
 0x272   :  { %v1721_v1 = vpack.c.bf16 %v1697_v45, %v1695_v32  ;;  %v1646_v34 = vadd.f32 %v1645_v29, %v3468_v50  ;;  %v1698_v3 = vmax.f32 %v1644_v53, 0.0  ;;  %2641 = vmatpush3.bf16.msra.mxu1 %v2961_v31  ;;  %v2963_v32 = vld [vmem:[#allocation10 + $0x10] sm:$0xff]  }
 0x273   :  { %v1647_v14 = vpop.f32.mrf.mxu1  ;;  %2642 = vmatprep.subr.bf16.mxu1 %v2962_v17 }
 0x274   :  { %v1648_v16 = vadd.f32 %v1647_v14, %v3472_v2  ;;  %1921 = vmatprep.mubr.bf16.mxu0 %v1721_v1  ;;  %v1699_v37 = vmax.f32 %v1646_v34, 0.0  ;;  %v3509_v1 = vld [vmem:[%s3702_s6] ss:$0 sm:$0xff] }
 0x275   :  { %v1649_v12 = vpop.f32.mrf.mxu1  ;;  %1922 = vmatmul.mubr.bf16.gmra.mxu0 %v1720_v48 }
 0x276   :  { %v1650_v52 = vadd.f32 %v1649_v12, %v3468_v50  ;;  %v1700_v54 = vmax.f32 %v1648_v16, 0.0  ;;  %2643 = vmatpush3.bf16.msra.mxu1 %v2962_v17 }
 0x277   :  { %v1653_v49 = vpop.f32.mrf.mxu1  ;;  %2644 = vmatprep.subr.bf16.mxu1 %v2963_v32 }
 0x278   :  { %v1701_v41 = vmax.f32 %v1650_v52, 0.0  ;;  %v1722_v47 = vpack.c.bf16 %v1700_v54, %v1698_v3  ;;  %v1654_v40 = vadd.f32 %v1653_v49, %v3472_v2 }
 0x279   :  { %v1655_v33 = vpop.f32.mrf.mxu1 }
 0x27a   :  { %v1723_v60 = vpack.c.bf16 %v1701_v41, %v1699_v37  ;;  %v1656_v38 = vadd.f32 %v1655_v33, %v3468_v50  ;;  %v1702_v61 = vmax.f32 %v1654_v40, 0.0  ;;  %2645 = vmatpush3.bf16.msra.mxu1 %v2963_v32 }
 0x27b   :  { %v1657_v7 = vpop.f32.mrf.mxu1 }
 0x27c   :  { %v1658_v5 = vadd.f32 %v1657_v7, %v3472_v2  ;;  %1929 = vmatprep.mubr.bf16.mxu0 %v1723_v60  ;;  %v1703_v10 = vmax.f32 %v1656_v38, 0.0 }
 0x27d   :  { %v1659_v9 = vpop.f32.mrf.mxu1  ;;  %1930 = vmatmul.mubr.bf16.gmra.mxu0 %v1722_v47 }
 0x27e   :  { %v1660_v35 = vadd.f32 %v1659_v9, %v3468_v50  ;;  %v1704_v4 = vmax.f32 %v1658_v5, 0.0 }
 0x27f   :  { %v1663_v36 = vpop.f32.mrf.mxu1 }
 0x280   :  { %v1705_v25 = vmax.f32 %v1660_v35, 0.0  ;;  %v1724_v26 = vpack.c.bf16 %v1704_v4, %v1702_v61  ;;  %v1664_v23 = vadd.f32 %v1663_v36, %v3472_v2 }
 0x281   :  { %v1665_v42 = vpop.f32.mrf.mxu1 }
 0x282   :  { %v1725_v8 = vpack.c.bf16 %v1705_v25, %v1703_v10  ;;  %v1666_v22 = vadd.f32 %v1665_v42, %v3468_v50  ;;  %v1706_v39 = vmax.f32 %v1664_v23, 0.0 }
 0x283   :  { %v1667_v18 = vpop.f32.mrf.mxu1 }
 0x284   :  { %v1668_v63 = vadd.f32 %v1667_v18, %v3472_v2  ;;  %1937 = vmatprep.mubr.bf16.mxu0 %v1725_v8  ;;  %v1707_v0 = vmax.f32 %v1666_v22, 0.0 }
 0x285   :  { %v1669_v44 = vpop.f32.mrf.mxu1  ;;  %1938 = vmatmul.mubr.bf16.gmra.mxu0 %v1724_v26 }
 0x286   :  { %v1670_v24 = vadd.f32 %v1669_v44, %v3468_v50  ;;  %v1708_v28 = vmax.f32 %v1668_v63, 0.0 }
 0x287   :  { %v1673_v27 = vpop.f32.mrf.mxu1 }
 0x288   :  { %v1709_v21 = vmax.f32 %v1670_v24, 0.0  ;;  %v1726_v55 = vpack.c.bf16 %v1708_v28, %v1706_v39  ;;  %v1674_v13 = vadd.f32 %v1673_v27, %v3472_v2 }
 0x289   :  { %v1675_v15 = vpop.f32.mrf.mxu1 }
 0x28a   :  { %v1727_v62 = vpack.c.bf16 %v1709_v21, %v1707_v0  ;;  %v1676_v30 = vadd.f32 %v1675_v15, %v3468_v50  ;;  %v1710_v56 = vmax.f32 %v1674_v13, 0.0 }
 0x28b   :  { %v1677_v58 = vpop.f32.mrf.mxu1 }
 0x28c   :  { %v1678_v59 = vadd.f32 %v1677_v58, %v3472_v2  ;;  %1945 = vmatprep.mubr.bf16.mxu0 %v1727_v62  ;;  %v1711_v46 = vmax.f32 %v1676_v30, 0.0  ;;  %v2964_v2 = vld [vmem:[#allocation10 + $0x8] sm:$0xff]  }
 0x28d   :  { %v1679_v43 = vpop.f32.mrf.mxu1  ;;  %1946 = vmatmul.mubr.bf16.gmra.mxu0 %v1726_v55  ;;  %2646 = vmatprep.subr.bf16.mxu1 %v2964_v2 }
 0x28e   :  { %v1680_v20 = vadd.f32 %v1679_v43, %v3468_v50  ;;  %v1712_v57 = vmax.f32 %v1678_v59, 0.0  ;;  %2647 = vmatpush3.bf16.msra.mxu1 %v2964_v2  ;;  %v2965_v50 = vld [vmem:[#allocation10] sm:$0xff]  }
 0x28f   :  { %2648 = vmatprep.subr.bf16.mxu1 %v2965_v50 }
 0x290   :  { %v1713_v51 = vmax.f32 %v1680_v20, 0.0  ;;  %v1728_v11 = vpack.c.bf16 %v1712_v57, %v1710_v56 }
 0x292   :  { %v1729_v6 = vpack.c.bf16 %v1713_v51, %v1711_v46  ;;  %2649 = vmatpush3.bf16.msra.mxu1 %v2965_v50 }
 0x294   :  { %1953 = vmatprep.mubr.bf16.mxu0 %v1729_v6 }
 0x295   :  { %1954 = vmatmul.mubr.bf16.gmra.mxu0 %v1728_v11 }
 0x31d   :  { %v2570_v45 = vpop.f32.mrf.mxu0 }
 0x31f   :  { %v2571_v19 = vpop.f32.mrf.mxu0 }
 0x320   :  { %v2572_v29 = vadd.f32 %v2571_v19, %v2570_v45 }
 0x321   :  { %v2573_v48 = vpop.f32.mrf.mxu0 }
 0x322   :  { %v1900_v34 = vadd.f32 %v2572_v29, %v3509_v1 }
 0x323   :  { %v2574_v14 = vpop.f32.mrf.mxu0 }
 0x324   :  { %v2575_v16 = vadd.f32 %v2574_v14, %v2573_v48  ;;  %v1962_v54 = vmax.f32 %v1900_v34, 0.0 }
 0x325   :  { %v2576_v53 = vpop.f32.mrf.mxu0 }
 0x326   :  { %v1903_v12 = vadd.f32 %v2575_v16, %v3509_v1 }
 0x327   :  { %v2577_v52 = vpop.f32.mrf.mxu0 }
 0x328   :  { %v1963_v49 = vmax.f32 %v1903_v12, 0.0  ;;  %v2578_v37 = vadd.f32 %v2577_v52, %v2576_v53 }
 0x329   :  { %v2579_v41 = vpop.f32.mrf.mxu0 }
 0x32a   :  { %v1978_v3 = vpack.c.bf16 %v1963_v49, %v1962_v54  ;;  %v1908_v60 = vadd.f32 %v2578_v37, %v3509_v1 }
 0x32b   :  { %v2580_v33 = vpop.f32.mrf.mxu0 }
 0x32c   :  { %v2581_v47 = vadd.f32 %v2580_v33, %v2579_v41  ;;  %2650 = vmatprep.mubr.bf16.mxu1 %v1978_v3  ;;  %v1964_v40 = vmax.f32 %v1908_v60, 0.0 }
 0x32d   :  { %v2582_v7 = vpop.f32.mrf.mxu0 }
 0x32e   :  { %v1911_v38 = vadd.f32 %v2581_v47, %v3509_v1 }
 0x32f   :  { %v2583_v5 = vpop.f32.mrf.mxu0 }
 0x330   :  { %v1965_v9 = vmax.f32 %v1911_v38, 0.0  ;;  %v2584_v35 = vadd.f32 %v2583_v5, %v2582_v7 }
 0x331   :  { %v2585_v4 = vpop.f32.mrf.mxu0 }
 0x332   :  { %v1979_v36 = vpack.c.bf16 %v1965_v9, %v1964_v40  ;;  %v1916_v25 = vadd.f32 %v2584_v35, %v3509_v1 }
 0x333   :  { %v2586_v10 = vpop.f32.mrf.mxu0 }
 0x334   :  { %v2587_v61 = vadd.f32 %v2586_v10, %v2585_v4  ;;  %2651 = vmatmul.mubr.bf16.vlgmr.msra.gmra.mxu1 %v1979_v36  ;;  %v1966_v18 = vmax.f32 %v1916_v25, 0.0  ;;  %v3719_v36 = vlaneseq  ;;  %v2545_v25 = vld [vmem:[%s3704_s8] ss:$0 sm:$0xff]  ;;  %s3169_s8 = smov [#allocation11]  }
 0x335   :  { %v2588_v42 = vpop.f32.mrf.mxu0  ;;  %s2338_s21 = sshll.u32 %s3169_s8, 4  ;;  %s2339_s21 = int_to_ptr.vmem [resolvable:$true] %s2338_s21 }
 0x336   :  { %v1919_v8 = vadd.f32 %v2587_v61, %v3509_v1  ;;  %v3528_v10 = vand.u32 127, %v3719_v36  ;;  %s3130_s22 = scalar_lea.vmem %s2339_s21, 2048  ;;  %p3135_p12 = scmp.lt.s32.totalorder %s2339_s21, %s2339_s21 }
 0x337   :  { %v2589_v26 = vpop.f32.mrf.mxu0  ;;  %p3131_p11 = scmp.ne.s32.totalorder %s2339_s21, %s3130_s22  ;;  %p3136_p13 = scmp.lt.s32.totalorder %s3130_s22, %s3130_s22 }
 0x338   :  { %v1967_v22 = vmax.f32 %v1919_v8, 0.0  ;;  %v2590_v63 = vadd.f32 %v2589_v26, %v2588_v42  ;;  %vm2156_vm0 = vcmp.lt.s32.totalorder %v3528_v10, 4 }
 0x339   :  { %v2591_v23 = vpop.f32.mrf.mxu0  ;;  %p3137_p0 = por %p3136_p13, %p3135_p12 }
 0x33a   :  { %v1980_v44 = vpack.c.bf16 %v1967_v22, %v1966_v18  ;;  %v1924_v28 = vadd.f32 %v2590_v63, %v3509_v1 }
 0x33b   :  { %v2592_v24 = vpop.f32.mrf.mxu0  ;;  %p3138_p1 = pnand %p3137_p0, %p3131_p11 }
 0x33c   :  { %v2593_v27 = vadd.f32 %v2592_v24, %v2591_v23  ;;  %2654 = vmatprep.mubr.bf16.mxu1 %v1980_v44  ;;  %v1968_v15 = vmax.f32 %v1924_v28, 0.0 }
 0x33d   :  { %v2594_v0 = vpop.f32.mrf.mxu0 }
 0x33e   :  { %v1927_v21 = vadd.f32 %v2593_v27, %v3509_v1 }
 0x33f   :  { %v2595_v39 = vpop.f32.mrf.mxu0 }
 0x340   :  { %v1969_v62 = vmax.f32 %v1927_v21, 0.0  ;;  %v2596_v55 = vadd.f32 %v2595_v39, %v2594_v0 }
 0x341   :  { %v2597_v58 = vpop.f32.mrf.mxu0 }
 0x342   :  { %v1981_v30 = vpack.c.bf16 %v1969_v62, %v1968_v15  ;;  %v1932_v13 = vadd.f32 %v2596_v55, %v3509_v1 }
 0x343   :  { %v2598_v59 = vpop.f32.mrf.mxu0 }
 0x344   :  { %v2599_v43 = vadd.f32 %v2598_v59, %v2597_v58  ;;  %2655 = vmatmul.mubr.bf16.gmra.mxu1 %v1981_v30  ;;  %v1970_v51 = vmax.f32 %v1932_v13, 0.0 }
 0x345   :  { %v2600_v20 = vpop.f32.mrf.mxu0 }
 0x346   :  { %v1935_v57 = vadd.f32 %v2599_v43, %v3509_v1 }
 0x347   :  { %v2601_v46 = vpop.f32.mrf.mxu0 }
 0x348   :  { %v1971_v56 = vmax.f32 %v1935_v57, 0.0  ;;  %v2602_v6 = vadd.f32 %v2601_v46, %v2600_v20 }
 0x349   :  { %v2603_v11 = vpop.f32.mrf.mxu0 }
 0x34a   :  { %v1982_v31 = vpack.c.bf16 %v1971_v56, %v1970_v51  ;;  %v1940_v32 = vadd.f32 %v2602_v6, %v3509_v1 }
 0x34b   :  { %v2604_v17 = vpop.f32.mrf.mxu0 }
 0x34c   :  { %v2605_v2 = vadd.f32 %v2604_v17, %v2603_v11  ;;  %2658 = vmatprep.mubr.bf16.mxu1 %v1982_v31  ;;  %v1972_v29 = vmax.f32 %v1940_v32, 0.0 }
 0x34d   :  { %v2606_v50 = vpop.f32.mrf.mxu0 }
 0x34e   :  { %v1943_v45 = vadd.f32 %v2605_v2, %v3509_v1 }
 0x34f   :  { %v2607_v19 = vpop.f32.mrf.mxu0 }
 0x350   :  { %v1973_v48 = vmax.f32 %v1943_v45, 0.0  ;;  %v2608_v14 = vadd.f32 %v2607_v19, %v2606_v50 }
 0x351   :  { %v2609_v34 = vpop.f32.mrf.mxu0 }
 0x352   :  { %v1983_v16 = vpack.c.bf16 %v1973_v48, %v1972_v29  ;;  %v1948_v12 = vadd.f32 %v2608_v14, %v3509_v1 }
 0x353   :  { %v2610_v53 = vpop.f32.mrf.mxu0 }
 0x354   :  { %v2611_v52 = vadd.f32 %v2610_v53, %v2609_v34  ;;  %2659 = vmatmul.mubr.bf16.gmra.mxu1 %v1983_v16  ;;  %v1974_v41 = vmax.f32 %v1948_v12, 0.0 }
 0x355   :  { %v2612_v54 = vpop.f32.mrf.mxu0 }
 0x356   :  { %v1951_v49 = vadd.f32 %v2611_v52, %v3509_v1 }
 0x357   :  { %v2613_v37 = vpop.f32.mrf.mxu0 }
 0x358   :  { %v1975_v3 = vmax.f32 %v1951_v49, 0.0  ;;  %v2614_v33 = vadd.f32 %v2613_v37, %v2612_v54 }
 0x359   :  { %v2615_v60 = vpop.f32.mrf.mxu0 }
 0x35a   :  { %v1984_v47 = vpack.c.bf16 %v1975_v3, %v1974_v41  ;;  %v1956_v38 = vadd.f32 %v2614_v33, %v3509_v1 }
 0x35b   :  { %v2616_v7 = vpop.f32.mrf.mxu0 }
 0x35c   :  { %v2617_v5 = vadd.f32 %v2616_v7, %v2615_v60  ;;  %2662 = vmatprep.mubr.bf16.mxu1 %v1984_v47  ;;  %v1976_v9 = vmax.f32 %v1956_v38, 0.0 }
 0x35e   :  { %v1959_v40 = vadd.f32 %v2617_v5, %v3509_v1 }
 0x360   :  { %v1977_v35 = vmax.f32 %v1959_v40, 0.0 }
 0x362   :  { %v1985_v4 = vpack.c.bf16 %v1977_v35, %v1976_v9 }
 0x364   :  { %2663 = vmatmul.mubr.bf16.gmra.mxu1 %v1985_v4 }
 0x3f4   :  { %v2652_v61 = vpop.f32.mrf.mxu1 }
 0x3f5   :  { %v2100_v42 = vadd.f32 %v2652_v61, %v2545_v25 }
 0x3f6   :  { %v2091_v8 = vpop.f32.mrf.mxu1 }
 0x3f7   :  { %v2092_v26 = vadd.f32 %v2545_v25, %v2091_v8  ;;  %v3536_v1 = vsel %vm2156_vm0, %v2100_v42, -1e+30 }
 0x3f8   :  { %2177 = vmax.xlane.f32.xlu1 %v3536_v1  ;;  %v2653_v18 = vpop.f32.mrf.mxu1 }
 0x3f9   :  { %v2103_v22 = vadd.f32 %v2653_v18, %v2545_v25  ;;  %v3541_v63 = vsel %vm2156_vm0, %v2092_v26, -1e+30 }
 0x3fa   :  { %v2094_v23 = vpop.f32.mrf.mxu1  ;;  %2173 = vmax.xlane.f32.xlu0 %v3541_v63 }
 0x3fb   :  { %v2095_v44 = vadd.f32 %v2545_v25, %v2094_v23  ;;  %v2160_v24 = vsel %vm2156_vm0, %v2103_v22, -1e+30 }
 0x3fc   :  { %2179 = vmax.xlane.f32.xlu1 %v2160_v24 }
 0x3fd   :  { %v3548_v28 = vsel %vm2156_vm0, %v2095_v44, -1e+30 }
 0x3fe   :  { %2175 = vmax.xlane.f32.xlu0 %v3548_v28 }
 0x404   :  { %v2656_v27 = vpop.f32.mrf.mxu1 }
 0x405   :  { %v2116_v0 = vadd.f32 %v2656_v27, %v2545_v25 }
 0x406   :  { %v2107_v21 = vpop.f32.mrf.mxu1 }
 0x407   :  { %v2108_v39 = vadd.f32 %v2545_v25, %v2107_v21  ;;  %v3553_v15 = vsel %vm2156_vm0, %v2116_v0, -1e+30 }
 0x408   :  { %v2657_v62 = vpop.f32.mrf.mxu1  ;;  %2185 = vmax.xlane.f32.xlu0 %v3553_v15 }
 0x409   :  { %v2119_v55 = vadd.f32 %v2657_v62, %v2545_v25  ;;  %v3562_v13 = vsel %vm2156_vm0, %v2108_v39, -1e+30 }
 0x40a   :  { %v2110_v58 = vpop.f32.mrf.mxu1 }
 0x40b   :  { %v2111_v30 = vadd.f32 %v2545_v25, %v2110_v58  ;;  %v3558_v59 = vsel %vm2156_vm0, %v2119_v55, -1e+30 }
 0x40c   :  { %2187 = vmax.xlane.f32.xlu1 %v3558_v59  ;;  %2181 = vmax.xlane.f32.xlu0 %v3562_v13 }
 0x40d   :  { %v3568_v43 = vsel %vm2156_vm0, %v2111_v30, -1e+30 }
 0x410   :  { %2183 = vmax.xlane.f32.xlu1 %v3568_v43 }
 0x414   :  { %v2660_v20 = vpop.f32.mrf.mxu1 }
 0x415   :  { %v2132_v57 = vadd.f32 %v2660_v20, %v2545_v25 }
 0x416   :  { %v2123_v46 = vpop.f32.mrf.mxu1 }
 0x417   :  { %v2124_v51 = vadd.f32 %v2545_v25, %v2123_v46  ;;  %v3573_v56 = vsel %vm2156_vm0, %v2132_v57, -1e+30 }
 0x418   :  { %v2661_v6 = vpop.f32.mrf.mxu1  ;;  %2193 = vmax.xlane.f32.xlu0 %v3573_v56 }
 0x419   :  { %v2135_v11 = vadd.f32 %v2661_v6, %v2545_v25  ;;  %v3582_v2 = vsel %vm2156_vm0, %v2124_v51, -1e+30 }
 0x41a   :  { %v2126_v31 = vpop.f32.mrf.mxu1 }
 0x41b   :  { %v2127_v17 = vadd.f32 %v2545_v25, %v2126_v31  ;;  %v3578_v32 = vsel %vm2156_vm0, %v2135_v11, -1e+30 }
 0x41c   :  { %2195 = vmax.xlane.f32.xlu1 %v3578_v32  ;;  %2189 = vmax.xlane.f32.xlu0 %v3582_v2 }
 0x41d   :  { %v3588_v50 = vsel %vm2156_vm0, %v2127_v17, -1e+30 }
 0x420   :  { %2191 = vmax.xlane.f32.xlu1 %v3588_v50 }
 0x424   :  { %v2664_v45 = vpop.f32.mrf.mxu1 }
 0x425   :  { %v2148_v14 = vadd.f32 %v2664_v45, %v2545_v25 }
 0x426   :  { %v2139_v19 = vpop.f32.mrf.mxu1 }
 0x427   :  { %v2140_v29 = vadd.f32 %v2545_v25, %v2139_v19  ;;  %v3602_v54 = vsel %vm2156_vm0, %v2148_v14, -1e+30 }
 0x428   :  { %v2665_v48 = vpop.f32.mrf.mxu1 }
 0x429   :  { %v3593_v34 = vsel %vm2156_vm0, %v2140_v29, -1e+30  ;;  %v2151_v12 = vadd.f32 %v2665_v48, %v2545_v25 }
 0x42a   :  { %v2142_v16 = vpop.f32.mrf.mxu1  ;;  %2197 = vmax.xlane.f32.xlu0 %v3593_v34 }
 0x42b   :  { %v2143_v53 = vadd.f32 %v2545_v25, %v2142_v16  ;;  %v3608_v49 = vsel %vm2156_vm0, %v2151_v12, -1e+30 }
 0x42d   :  { %v3598_v52 = vsel %vm2156_vm0, %v2143_v53, -1e+30 }
 0x42e   :  { %2199 = vmax.xlane.f32.xlu1 %v3598_v52  ;;  %2201 = vmax.xlane.f32.xlu0 %v3602_v54 }
 0x432   :  { %2203 = vmax.xlane.f32.xlu1 %v3608_v49 }
 0x481   :  { %v2178_v37 = vpop.xlane.xlu1 %2177 }
 0x482   :  { %v2207_v41 = vsub.f32 %v3536_v1, %v2178_v37 }
 0x483   :  { %v2174_v3 = vpop.xlane.xlu0 %2173 }
 0x484   :  { %v2225_v33 = vmul.f32 1.442695, %v2207_v41  ;;  %v2205_v60 = vsub.f32 %v3541_v63, %v2174_v3 }
 0x485   :  { %v2180_v47 = vpop.xlane.xlu1 %2179 }
 0x486   :  { %2966 = vpow2.f32 %v2225_v33  ;;  %v2221_v7 = vmul.f32 1.442695, %v2205_v60  ;;  %v2208_v38 = vsub.f32 %v2160_v24, %v2180_v47 }
 0x487   :  { %v2176_v5 = vpop.xlane.xlu0 %2175 }
 0x488   :  { %v2227_v40 = vmul.f32 1.442695, %v2208_v38  ;;  %v2206_v9 = vsub.f32 %v3548_v28, %v2176_v5  ;;  %2968 = vpow2.f32 %v2221_v7 }
 0x48a   :  { %2970 = vpow2.f32 %v2227_v40  ;;  %v2223_v35 = vmul.f32 1.442695, %v2206_v9 }
 0x48c   :  { %2972 = vpow2.f32 %v2223_v35 }
 0x491   :  { %v2186_v4 = vpop.xlane.xlu0 %2185 }
 0x492   :  { %v2211_v36 = vsub.f32 %v3553_v15, %v2186_v4 }
 0x493   :  { %v3615_v10 = vpop.eup %2966 }
 0x494   :  { %v2233_v25 = vmul.f32 1.442695, %v2211_v36  ;;  %2257 = vadd.xlane.f32.xlu0 %v3615_v10 }
 0x495   :  { %v2188_v61 = vpop.xlane.xlu1 %2187  ;;  %v2182_v42 = vpop.xlane.xlu0 %2181 }
 0x496   :  { %v3618_v8 = vpop.eup %2968  ;;  %2974 = vpow2.f32 %v2233_v25  ;;  %v2212_v26 = vsub.f32 %v3558_v59, %v2188_v61  ;;  %v2209_v1 = vsub.f32 %v3562_v13, %v2182_v42 }
 0x497   :  { %v3622_v18 = vpop.eup %2970 }
 0x498   :  { %v2235_v22 = vmul.f32 1.442695, %v2212_v26  ;;  %v2229_v63 = vmul.f32 1.442695, %v2209_v1  ;;  %2259 = vadd.xlane.f32.xlu1 %v3622_v18  ;;  %2253 = vadd.xlane.f32.xlu0 %v3618_v8 }
 0x499   :  { %v2184_v23 = vpop.xlane.xlu1 %2183  ;;  %v3627_v24 = vpop.eup %2972 }
 0x49a   :  { %2976 = vpow2.f32 %v2235_v22  ;;  %v2210_v44 = vsub.f32 %v3568_v43, %v2184_v23 }
 0x49b   :  { %2978 = vpow2.f32 %v2229_v63 }
 0x49c   :  { %v2231_v28 = vmul.f32 1.442695, %v2210_v44  ;;  %2255 = vadd.xlane.f32.xlu1 %v3627_v24 }
 0x49e   :  { %2980 = vpow2.f32 %v2231_v28 }
 0x4a1   :  { %v2194_v27 = vpop.xlane.xlu0 %2193 }
 0x4a2   :  { %v2215_v0 = vsub.f32 %v3573_v56, %v2194_v27 }
 0x4a3   :  { %v3631_v21 = vpop.eup %2974 }
 0x4a4   :  { %v2241_v39 = vmul.f32 1.442695, %v2215_v0  ;;  %2265 = vadd.xlane.f32.xlu0 %v3631_v21 }
 0x4a5   :  { %v2196_v15 = vpop.xlane.xlu1 %2195  ;;  %v2190_v62 = vpop.xlane.xlu0 %2189 }
 0x4a6   :  { %2982 = vpow2.f32 %v2241_v39  ;;  %v2216_v55 = vsub.f32 %v3578_v32, %v2196_v15  ;;  %v2213_v58 = vsub.f32 %v3582_v2, %v2190_v62 }
 0x4a7   :  { %v3636_v30 = vpop.eup %2976 }
 0x4a8   :  { %v3638_v59 = vpop.eup %2978  ;;  %v2243_v13 = vmul.f32 1.442695, %v2216_v55  ;;  %v2237_v43 = vmul.f32 1.442695, %v2213_v58  ;;  %2267 = vadd.xlane.f32.xlu1 %v3636_v30 }
 0x4a9   :  { %2261 = vadd.xlane.f32.xlu0 %v3638_v59  ;;  %v2192_v20 = vpop.xlane.xlu1 %2191 }
 0x4aa   :  { %2984 = vpow2.f32 %v2243_v13  ;;  %v2214_v57 = vsub.f32 %v3588_v50, %v2192_v20 }
 0x4ab   :  { %v3643_v46 = vpop.eup %2980  ;;  %2986 = vpow2.f32 %v2237_v43 }
 0x4ac   :  { %v2239_v51 = vmul.f32 1.442695, %v2214_v57  ;;  %2263 = vadd.xlane.f32.xlu1 %v3643_v46 }
 0x4ae   :  { %2988 = vpow2.f32 %v2239_v51 }
 0x4b3   :  { %v3646_v56 = vpop.eup %2982  ;;  %v2198_v6 = vpop.xlane.xlu0 %2197 }
 0x4b4   :  { %v2217_v11 = vsub.f32 %v3593_v34, %v2198_v6  ;;  %2273 = vadd.xlane.f32.xlu0 %v3646_v56 }
 0x4b6   :  { %v2245_v31 = vmul.f32 1.442695, %v2217_v11 }
 0x4b7   :  { %v3650_v17 = vpop.eup %2984  ;;  %v2200_v32 = vpop.xlane.xlu1 %2199 }
 0x4b8   :  { %v2202_v2 = vpop.xlane.xlu0 %2201  ;;  %v3652_v50 = vpop.eup %2986  ;;  %2990 = vpow2.f32 %v2245_v31  ;;  %v2218_v45 = vsub.f32 %v3598_v52, %v2200_v32  ;;  %2275 = vadd.xlane.f32.xlu1 %v3650_v17 }
 0x4b9   :  { %v2219_v19 = vsub.f32 %v3602_v54, %v2202_v2  ;;  %2269 = vadd.xlane.f32.xlu0 %v3652_v50 }
 0x4ba   :  { %v2247_v29 = vmul.f32 1.442695, %v2218_v45 }
 0x4bb   :  { %v2249_v48 = vmul.f32 1.442695, %v2219_v19  ;;  %v3658_v14 = vpop.eup %2988  ;;  %v2204_v34 = vpop.xlane.xlu1 %2203 }
 0x4bc   :  { %2992 = vpow2.f32 %v2247_v29  ;;  %v2220_v16 = vsub.f32 %v3608_v49, %v2204_v34  ;;  %2271 = vadd.xlane.f32.xlu1 %v3658_v14 }
 0x4bd   :  { %2994 = vpow2.f32 %v2249_v48 }
 0x4be   :  { %v2251_v53 = vmul.f32 1.442695, %v2220_v16 }
 0x4c0   :  { %2996 = vpow2.f32 %v2251_v53 }
 0x4c5   :  { %v3662_v12 = vpop.eup %2990 }
 0x4c6   :  { %2277 = vadd.xlane.f32.xlu0 %v3662_v12 }
 0x4c9   :  { %v3665_v52 = vpop.eup %2992 }
 0x4ca   :  { %v3667_v54 = vpop.eup %2994  ;;  %2279 = vadd.xlane.f32.xlu1 %v3665_v52 }
 0x4cb   :  { %2281 = vadd.xlane.f32.xlu0 %v3667_v54 }
 0x4cd   :  { %v3671_v37 = vpop.eup %2996 }
 0x4ce   :  { %2283 = vadd.xlane.f32.xlu1 %v3671_v37 }
 0x51d   :  { %v2258_v49 = vpop.xlane.xlu0 %2257 }
 0x51e   :  { %2998 = vrcp.f32 %v2258_v49 }
 0x521   :  { %v2260_v41 = vpop.xlane.xlu1 %2259  ;;  %v2254_v3 = vpop.xlane.xlu0 %2253 }
 0x522   :  { %3000 = vrcp.f32 %v2260_v41 }
 0x523   :  { %3002 = vrcp.f32 %v2254_v3 }
 0x525   :  { %v2256_v33 = vpop.xlane.xlu1 %2255 }
 0x526   :  { %3004 = vrcp.f32 %v2256_v33 }
 0x52b   :  { %v2999_v60 = vpop.eup %2998 }
 0x52c   :  { %v2303_v47 = vmul.f32 %v2999_v60, %v3615_v10 }
 0x52d   :  { %v2266_v7 = vpop.xlane.xlu0 %2265 }
 0x52e   :  { %2319 = vst [vmem:[#allocation11 + $0x10] sm:$0xff] %v2303_v47  ;;  %3006 = vrcp.f32 %v2266_v7 }
 0x52f   :  { %v3001_v38 = vpop.eup %3000 }
 0x530   :  { %v3003_v5 = vpop.eup %3002  ;;  %v2304_v40 = vmul.f32 %v3001_v38, %v3622_v18 }
 0x531   :  { %v2301_v9 = vmul.f32 %v3003_v5, %v3618_v8  ;;  %v2268_v35 = vpop.xlane.xlu1 %2267 }
 0x532   :  { %2320 = vst [vmem:[#allocation11 + $0x18] sm:$0xff] %v2304_v40  ;;  %3008 = vrcp.f32 %v2268_v35  ;;  %v2262_v4 = vpop.xlane.xlu0 %2261 }
 0x533   :  { %v3005_v36 = vpop.eup %3004  ;;  %2317 = vst [vmem:[#allocation11] sm:$0xff] %v2301_v9  ;;  %3010 = vrcp.f32 %v2262_v4 }
 0x534   :  { %v2302_v25 = vmul.f32 %v3005_v36, %v3627_v24 }
 0x535   :  { %v2264_v61 = vpop.xlane.xlu1 %2263 }
 0x536   :  { %2318 = vst [vmem:[#allocation11 + $0x8] sm:$0xff] %v2302_v25  ;;  %3012 = vrcp.f32 %v2264_v61 }
 0x53b   :  { %v3007_v10 = vpop.eup %3006 }
 0x53c   :  { %v2307_v42 = vmul.f32 %v3007_v10, %v3631_v21 }
 0x53d   :  { %v2274_v26 = vpop.xlane.xlu0 %2273 }
 0x53e   :  { %2323 = vst [vmem:[#allocation11 + $0x30] sm:$0xff] %v2307_v42  ;;  %3014 = vrcp.f32 %v2274_v26 }
 0x53f   :  { %v3009_v1 = vpop.eup %3008 }
 0x540   :  { %v3011_v8 = vpop.eup %3010  ;;  %v2308_v18 = vmul.f32 %v3009_v1, %v3636_v30 }
 0x541   :  { %v2305_v22 = vmul.f32 %v3011_v8, %v3638_v59  ;;  %v2276_v63 = vpop.xlane.xlu1 %2275 }
 0x542   :  { %2324 = vst [vmem:[#allocation11 + $0x38] sm:$0xff] %v2308_v18  ;;  %3016 = vrcp.f32 %v2276_v63  ;;  %v2270_v23 = vpop.xlane.xlu0 %2269 }
 0x543   :  { %v3013_v44 = vpop.eup %3012  ;;  %2321 = vst [vmem:[#allocation11 + $0x20] sm:$0xff] %v2305_v22  ;;  %3018 = vrcp.f32 %v2270_v23 }
 0x544   :  { %v2306_v24 = vmul.f32 %v3013_v44, %v3643_v46 }
 0x545   :  { %v2272_v28 = vpop.xlane.xlu1 %2271 }
 0x546   :  { %2322 = vst [vmem:[#allocation11 + $0x28] sm:$0xff] %v2306_v24  ;;  %3020 = vrcp.f32 %v2272_v28 }
 0x54b   :  { %v3015_v27 = vpop.eup %3014 }
 0x54c   :  { %v2311_v0 = vmul.f32 %v3015_v27, %v3646_v56 }
 0x54e   :  { %2327 = vst [vmem:[#allocation11 + $0x50] sm:$0xff] %v2311_v0 }
 0x54f   :  { %v3017_v21 = vpop.eup %3016  ;;  %v2278_v39 = vpop.xlane.xlu0 %2277 }
 0x550   :  { %v3019_v15 = vpop.eup %3018  ;;  %v2312_v62 = vmul.f32 %v3017_v21, %v3650_v17  ;;  %3022 = vrcp.f32 %v2278_v39 }
 0x551   :  { %v2309_v55 = vmul.f32 %v3019_v15, %v3652_v50 }
 0x552   :  { %2328 = vst [vmem:[#allocation11 + $0x58] sm:$0xff] %v2312_v62 }
 0x553   :  { %v3021_v58 = vpop.eup %3020  ;;  %2325 = vst [vmem:[#allocation11 + $0x40] sm:$0xff] %v2309_v55  ;;  %v2280_v30 = vpop.xlane.xlu1 %2279 }
 0x554   :  { %v2310_v59 = vmul.f32 %v3021_v58, %v3658_v14  ;;  %3024 = vrcp.f32 %v2280_v30  ;;  %v2282_v13 = vpop.xlane.xlu0 %2281 }
 0x555   :  { %3026 = vrcp.f32 %v2282_v13 }
 0x556   :  { %2326 = vst [vmem:[#allocation11 + $0x48] sm:$0xff] %v2310_v59 }
 0x557   :  { %v2284_v43 = vpop.xlane.xlu1 %2283 }
 0x558   :  { %3028 = vrcp.f32 %v2284_v43 }
 0x55d   :  { %v3023_v20 = vpop.eup %3022 }
 0x55e   :  { %v2313_v57 = vmul.f32 %v3023_v20, %v3662_v12 }
 0x560   :  { %2329 = vst [vmem:[#allocation11 + $0x60] sm:$0xff] %v2313_v57 }
 0x561   :  { %v3025_v46 = vpop.eup %3024 }
 0x562   :  { %v3027_v51 = vpop.eup %3026  ;;  %v2314_v56 = vmul.f32 %v3025_v46, %v3665_v52 }
 0x563   :  { %v2315_v6 = vmul.f32 %v3027_v51, %v3667_v54 }
 0x564   :  { %2330 = vst [vmem:[#allocation11 + $0x68] sm:$0xff] %v2314_v56 }
 0x565   :  { %v3029_v11 = vpop.eup %3028  ;;  %2331 = vst [vmem:[#allocation11 + $0x70] sm:$0xff] %v2315_v6 }
 0x566   :  { %v2316_v31 = vmul.f32 %v3029_v11, %v3671_v37 }
 0x568   :  { %2332 = vst [vmem:[#allocation11 + $0x78] sm:$0xff] %v2316_v31 }
 0x569   :  { %3141 = shalt.err (!%p3138_p1)
}
 0x56a   :  { %2344 = dma.vmem_to_hbm [thread:$0]  %s2339_s21, 2048, %s3705_s9, [#allocation4], %s3159_s12, %s3159_s12, %s3160_s13  }
 0x56b   :  { %3156 = dma.done.wait [#allocation4], 2048  }
 0x56c   :  { %3157 = vsyncadd [#allocation4], 4294965248 }
 0x56d   :  { %2348 = vsyncpa [#allocation3], 1 }
 0x56e   :  { %2349 = vsyncpa [#allocation6], 1 }
 0x56f   :  { %2350 = vsyncpa [#allocation9], 1 }
 0x570   :  { %2351 = vsyncpa [#allocation4], 1 }

</bundles_post_ra>
